<compile_context>
chip_gen: v7x
topology: tpu7x:2x2x1
jax: 0.10.0
libtpu: 0.0.40
codegen_flags: <defaults>
</compile_context>

<pallas_src>
import jax
import jax.numpy as jnp
import numpy as np
from jax import lax
from jax.experimental import pallas as pl
from jax.experimental.pallas import tpu as pltpu

EPS = 1e-5  # nn.BatchNorm2d default eps


# --------------------------------------------------------------------------- #
# Pass 1: conv1 (im2col, one K=9*Cin bf16 matmul) + per-sample BN1 partial stats
# --------------------------------------------------------------------------- #
def conv1_kernel(xp_ref, w1_ref, y1_ref, st_ref):
    # xp_ref : (H+2, W+2, Cin) f32, zero-padded input for ONE sample
    # w1_ref : (9*Cin, Cout)   bf16 im2col-fused conv1 weights
    # y1_ref : (H*W, Cout)     f32 conv1 output rows for this sample
    # st_ref : (2, Cout)       f32 per-sample [sum; sum-of-squares] per channel
    Hp, Wp, Cin = xp_ref.shape
    H, W = Hp - 2, Wp - 2
    p1 = jnp.concatenate(
        [xp_ref[dy:dy + H, dx:dx + W, :].astype(jnp.bfloat16)
         for dy in range(3) for dx in range(3)],
        axis=-1).reshape(H * W, 9 * Cin)                      # bf16 patches
    acc = jnp.dot(p1, w1_ref[...], preferred_element_type=jnp.float32)
    y1_ref[...] = acc
    s = jnp.sum(acc, axis=0, keepdims=True)
    q = jnp.sum(acc * acc, axis=0, keepdims=True)
    st_ref[...] = jnp.concatenate([s, q], axis=0)


# --------------------------------------------------------------------------- #
# Pass 2: BN1 affine + ReLU -> padded VMEM scratch -> conv2 + BN2 partial stats
# --------------------------------------------------------------------------- #
def conv2_kernel(y1_ref, sc1_ref, sh1_ref, w2_ref, y2_ref, st_ref, hpad_ref):
    # y1_ref  : (H*W, Cout) f32     sc1/sh1 : (1, Cout) f32 folded BN1 affine
    # w2_ref  : (9*Cout, Cout) bf16
    # y2_ref  : (H*W, Cout) f32     st_ref  : (2, Cout) f32
    # hpad_ref: (H+2, W+2, Cout) f32 VMEM scratch (zero-padded conv2 input)
    Hp, Wp, C = hpad_ref.shape
    H, W = Hp - 2, Wp - 2

    # Zero the 1-pixel border every step: with "parallel" grid semantics each
    # TensorCore has its own scratch and may start at program_id > 0, so a
    # pl.when(pid == 0)-only init would be unsafe.  Border-only stores are tiny.
    zrow = jnp.zeros((1, Wp, C), jnp.float32)
    hpad_ref[0:1, :, :] = zrow
    hpad_ref[Hp - 1:Hp, :, :] = zrow
    zcol = jnp.zeros((Hp, 1, C), jnp.float32)
    hpad_ref[:, 0:1, :] = zcol
    hpad_ref[:, Wp - 1:Wp, :] = zcol

    # BN1 folded affine + ReLU, written into the scratch interior.
    h = jnp.maximum(y1_ref[...] * sc1_ref[...] + sh1_ref[...], 0.0)
    hpad_ref[1:H + 1, 1:W + 1, :] = h.reshape(H, W, C)

    # im2col from the padded scratch ref: 9 shifted windows, cast to bf16.
    p2 = jnp.concatenate(
        [hpad_ref[dy:dy + H, dx:dx + W, :].astype(jnp.bfloat16)
         for dy in range(3) for dx in range(3)],
        axis=-1).reshape(H * W, 9 * C)
    acc = jnp.dot(p2, w2_ref[...], preferred_element_type=jnp.float32)
    y2_ref[...] = acc
    s = jnp.sum(acc, axis=0, keepdims=True)
    q = jnp.sum(acc * acc, axis=0, keepdims=True)
    st_ref[...] = jnp.concatenate([s, q], axis=0)


# --------------------------------------------------------------------------- #
# Pass 3: BN2 affine + identity residual + ReLU, fully lane-dense elementwise
# --------------------------------------------------------------------------- #
def bn2_residual_kernel(y2_ref, x_ref, sc2_ref, sh2_ref, o_ref):
    # y2_ref/x_ref/o_ref : (H, W*C) f32   sc2/sh2 : (1, W*C) f32 (channel-tiled)
    o_ref[...] = jnp.maximum(
        y2_ref[...] * sc2_ref[...] + sh2_ref[...] + x_ref[...], 0.0)


# --------------------------------------------------------------------------- #
# Wrapper
# --------------------------------------------------------------------------- #
def basic_block_pallas(x_nchw, w1, g1, b1, w2, g2, b2):
    """x_nchw: (N, Cin, H, W); w*: (Cout, Cin, 3, 3) PyTorch conv layout."""
    N, Cin, H, W = x_nchw.shape
    Cout = w1.shape[0]
    assert Cin == Cout, "identity residual requires in_channel == out_channel"
    Hp, Wp = H + 2, W + 2
    R_img = H * W
    R_tot = N * H * W

    # Layout glue (wrapper-side, plain XLA): NCHW -> NHWC, zero pad, weights to
    # a single (9*Cin, Cout) matrix whose row order (ky, kx, cin) matches the
    # tap order used when concatenating the 9 shifted windows.
    x_nhwc = jnp.transpose(x_nchw, (0, 2, 3, 1)).astype(jnp.float32)
    xp = jnp.pad(x_nhwc, ((0, 0), (1, 1), (1, 1), (0, 0)))
    w1_mat = jnp.transpose(w1, (2, 3, 1, 0)).reshape(9 * Cin, Cout).astype(jnp.bfloat16)
    w2_mat = jnp.transpose(w2, (2, 3, 1, 0)).reshape(9 * Cout, Cout).astype(jnp.bfloat16)

    cp = pltpu.CompilerParams(dimension_semantics=("parallel",))

    # ---------------- pass 1: conv1 + per-sample BN1 partial stats ----------
    y1, st1 = pl.pallas_call(
        conv1_kernel,
        grid=(N,),
        in_specs=[
            pl.BlockSpec((None, Hp, Wp, Cin), lambda n: (n, 0, 0, 0)),
            pl.BlockSpec((9 * Cin, Cout), lambda n: (0, 0)),
        ],
        out_specs=(
            pl.BlockSpec((None, R_img, Cout), lambda n: (n, 0, 0)),
            pl.BlockSpec((None, 2, Cout), lambda n: (n, 0, 0)),
        ),
        out_shape=(
            jax.ShapeDtypeStruct((N, R_img, Cout), jnp.float32),
            jax.ShapeDtypeStruct((N, 2, Cout), jnp.float32),
        ),
        compiler_params=cp,
    )(xp, w1_mat)

    # Finalize BN1 (tiny per-channel math).  Biased variance, training-mode BN.
    # NOTE: E[x^2]-mean^2 in f32 is adequate here; a Welford/two-pass variant
    # would be preferred at very large R if |mean| >> std.
    s1 = jnp.sum(st1[:, 0, :], axis=0)
    q1 = jnp.sum(st1[:, 1, :], axis=0)
    mean1 = s1 / R_tot
    var1 = q1 / R_tot - mean1 * mean1
    inv_std1 = lax.rsqrt(var1 + EPS)
    scale1 = (g1.astype(jnp.float32) * inv_std1).reshape(1, Cout)
    shift1 = (b1.astype(jnp.float32) - mean1 * g1.astype(jnp.float32) * inv_std1
              ).reshape(1, Cout)

    # ------- pass 2: BN1 affine + ReLU + conv2 + per-sample BN2 stats -------
    y2, st2 = pl.pallas_call(
        conv2_kernel,
        grid=(N,),
        in_specs=[
            pl.BlockSpec((None, R_img, Cout), lambda n: (n, 0, 0)),
            pl.BlockSpec((1, Cout), lambda n: (0, 0)),
            pl.BlockSpec((1, Cout), lambda n: (0, 0)),
            pl.BlockSpec((9 * Cout, Cout), lambda n: (0, 0)),
        ],
        out_specs=(
            pl.BlockSpec((None, R_img, Cout), lambda n: (n, 0, 0)),
            pl.BlockSpec((None, 2, Cout), lambda n: (n, 0, 0)),
        ),
        out_shape=(
            jax.ShapeDtypeStruct((N, R_img, Cout), jnp.float32),
            jax.ShapeDtypeStruct((N, 2, Cout), jnp.float32),
        ),
        scratch_shapes=[pltpu.VMEM((Hp, Wp, Cout), jnp.float32)],
        compiler_params=cp,
    )(y1, scale1, shift1, w2_mat)

    # Finalize BN2.
    s2 = jnp.sum(st2[:, 0, :], axis=0)
    q2 = jnp.sum(st2[:, 1, :], axis=0)
    mean2 = s2 / R_tot
    var2 = q2 / R_tot - mean2 * mean2
    inv_std2 = lax.rsqrt(var2 + EPS)
    scale2 = g2.astype(jnp.float32) * inv_std2
    shift2 = b2.astype(jnp.float32) - mean2 * scale2

    # ---------------- pass 3: BN2 + residual + ReLU (lane-dense) ------------
    # Trivial row-major reshapes (free) present everything lane-dense: the
    # last dim becomes W*C (3584 for 56x64 real shapes) so stores are unmasked.
    y2_ld = y2.reshape(N, H, W * Cout)
    x_ld = x_nhwc.reshape(N, H, W * Cin)
    scale2_t = jnp.tile(scale2.reshape(1, Cout), (1, W))   # channel fastest
    shift2_t = jnp.tile(shift2.reshape(1, Cout), (1, W))

    out_ld = pl.pallas_call(
        bn2_residual_kernel,
        grid=(N,),
        in_specs=[
            pl.BlockSpec((None, H, W * Cout), lambda n: (n, 0, 0)),
            pl.BlockSpec((None, H, W * Cin), lambda n: (n, 0, 0)),
            pl.BlockSpec((1, W * Cout), lambda n: (0, 0)),
            pl.BlockSpec((1, W * Cout), lambda n: (0, 0)),
        ],
        out_specs=pl.BlockSpec((None, H, W * Cout), lambda n: (n, 0, 0)),
        out_shape=jax.ShapeDtypeStruct((N, H, W * Cout), jnp.float32),
        compiler_params=cp,
    )(y2_ld, x_ld, scale2_t, shift2_t)

    out_nhwc = out_ld.reshape(N, H, W, Cout)
    return jnp.transpose(out_nhwc, (0, 3, 1, 2))            # back to NCHW


# --------------------------------------------------------------------------- #
# Pure-JAX f32 reference matching the PyTorch forward (training-mode BN)
# --------------------------------------------------------------------------- #
def basic_block_ref(x_nchw, w1, g1, b1, w2, g2, b2):
    x = jnp.transpose(x_nchw, (0, 2, 3, 1)).astype(jnp.float32)

    def conv(h, w):
        w_hwio = jnp.transpose(w, (2, 3, 1, 0)).astype(jnp.float32)
        return lax.conv_general_dilated(h, w_hwio, (1, 1), 'SAME',
                                        dimension_numbers=('NHWC', 'HWIO', 'NHWC'))

    def bn(h, g, b):
        m = jnp.mean(h, axis=(0, 1, 2), keepdims=True)
        v = jnp.mean((h - m) ** 2, axis=(0, 1, 2), keepdims=True)
        return (h - m) * lax.rsqrt(v + EPS) * g.reshape(1, 1, 1, -1) + b.reshape(1, 1, 1, -1)

    out = jax.nn.relu(bn(conv(x, w1), g1, b1))
    out = jax.nn.relu(bn(conv(out, w2), g2, b2) + x)
    return jnp.transpose(out, (0, 3, 1, 2))


if __name__ == "__main__":
    # small deterministic config: N=2, in_channel=out_channel=4, 16x16, stride=1
    # NOTE: for performance measurement use C >= 64 and realistic H, W; this
    # shape only exercises 4/128 lanes and exists for correctness checking.
    N, C, H, W = 2, 4, 16, 16
    key = jax.random.PRNGKey(0)
    kx, kw1, kw2, kg1, kb1, kg2, kb2 = jax.random.split(key, 7)

    x = jax.random.normal(kx, (N, C, H, W), jnp.float32)
    w1 = 0.1 * jax.random.normal(kw1, (C, C, 3, 3), jnp.float32)   # conv1 weight
    w2 = 0.1 * jax.random.normal(kw2, (C, C, 3, 3), jnp.float32)   # conv2 weight
    g1 = 1.0 + 0.1 * jax.random.normal(kg1, (C,), jnp.float32)     # bn1 gamma
    b1 = 0.1 * jax.random.normal(kb1, (C,), jnp.float32)           # bn1 beta
    g2 = 1.0 + 0.1 * jax.random.normal(kg2, (C,), jnp.float32)     # bn2 gamma
    b2 = 0.1 * jax.random.normal(kb2, (C,), jnp.float32)           # bn2 beta

    out = basic_block_pallas(x, w1, g1, b1, w2, g2, b2)
    out = jax.block_until_ready(out)

    ref = jax.block_until_ready(basic_block_ref(x, w1, g1, b1, w2, g2, b2))
    # Tolerance loosened vs. pure-f32: conv patches/weights are cast to bf16
    # for the MXU (f32 accumulation); BN / residual math stays in f32.
    if not np.allclose(np.asarray(out), np.asarray(ref), atol=3e-2, rtol=3e-2):
        max_err = float(np.max(np.abs(np.asarray(out) - np.asarray(ref))))
        raise AssertionError(f"Pallas BasicBlock does not match JAX reference "
                             f"(max abs err = {max_err})")

    print("KERNEL_OK")
</pallas_src>

<mosaic_0001>
module attributes {stable_mosaic.version = 11 : i64} {
  func.func @conv1_kernel(%arg0: i32, %arg1: memref<1x18x18x4xf32, #tpu.memory_space<vmem>>, %arg2: memref<36x4xbf16, #tpu.memory_space<vmem>>, %arg3: memref<1x256x4xf32, #tpu.memory_space<vmem>>, %arg4: memref<1x2x4xf32, #tpu.memory_space<vmem>>) attributes {dimension_semantics = [#tpu.dimension_semantics<parallel>], iteration_bounds = array<i64: 2>, scalar_prefetch = 0 : i64, scratch_operands = 0 : i64, tpu.core_type = #tpu.core_type<tc>, window_params = [{transform_indices = @transform_0, window_bounds = array<i64: 1, 18, 18, 4>}, {pipeline_mode = #tpu.pipeline_mode<synchronous>, transform_indices = @transform_1, window_bounds = array<i64: 36, 4>}, {transform_indices = @transform_2, window_bounds = array<i64: 1, 256, 4>}, {transform_indices = @transform_3, window_bounds = array<i64: 1, 2, 4>}]} {
    %c0 = arith.constant 0 : index
    %c0_0 = arith.constant 0 : index
    %c0_1 = arith.constant 0 : index
    %c0_2 = arith.constant 0 : index
    %0 = vector.load %arg1[%c0, %c0_0, %c0_1, %c0_2] : memref<1x18x18x4xf32, #tpu.memory_space<vmem>>, vector<1x16x16x4xf32>
    %1 = vector.shape_cast %0 : vector<1x16x16x4xf32> to vector<16x16x4xf32>
    %2 = arith.truncf %1 : vector<16x16x4xf32> to vector<16x16x4xbf16>
    %c0_3 = arith.constant 0 : index
    %c0_4 = arith.constant 0 : index
    %c1 = arith.constant 1 : index
    %c0_5 = arith.constant 0 : index
    %3 = vector.load %arg1[%c0_3, %c0_4, %c1, %c0_5] : memref<1x18x18x4xf32, #tpu.memory_space<vmem>>, vector<1x16x16x4xf32>
    %4 = vector.shape_cast %3 : vector<1x16x16x4xf32> to vector<16x16x4xf32>
    %5 = arith.truncf %4 : vector<16x16x4xf32> to vector<16x16x4xbf16>
    %c0_6 = arith.constant 0 : index
    %c0_7 = arith.constant 0 : index
    %c2 = arith.constant 2 : index
    %c0_8 = arith.constant 0 : index
    %6 = vector.load %arg1[%c0_6, %c0_7, %c2, %c0_8] : memref<1x18x18x4xf32, #tpu.memory_space<vmem>>, vector<1x16x16x4xf32>
    %7 = vector.shape_cast %6 : vector<1x16x16x4xf32> to vector<16x16x4xf32>
    %8 = arith.truncf %7 : vector<16x16x4xf32> to vector<16x16x4xbf16>
    %c0_9 = arith.constant 0 : index
    %c1_10 = arith.constant 1 : index
    %c0_11 = arith.constant 0 : index
    %c0_12 = arith.constant 0 : index
    %9 = vector.load %arg1[%c0_9, %c1_10, %c0_11, %c0_12] : memref<1x18x18x4xf32, #tpu.memory_space<vmem>>, vector<1x16x16x4xf32>
    %10 = vector.shape_cast %9 : vector<1x16x16x4xf32> to vector<16x16x4xf32>
    %11 = arith.truncf %10 : vector<16x16x4xf32> to vector<16x16x4xbf16>
    %c0_13 = arith.constant 0 : index
    %c1_14 = arith.constant 1 : index
    %c1_15 = arith.constant 1 : index
    %c0_16 = arith.constant 0 : index
    %12 = vector.load %arg1[%c0_13, %c1_14, %c1_15, %c0_16] : memref<1x18x18x4xf32, #tpu.memory_space<vmem>>, vector<1x16x16x4xf32>
    %13 = vector.shape_cast %12 : vector<1x16x16x4xf32> to vector<16x16x4xf32>
    %14 = arith.truncf %13 : vector<16x16x4xf32> to vector<16x16x4xbf16>
    %c0_17 = arith.constant 0 : index
    %c1_18 = arith.constant 1 : index
    %c2_19 = arith.constant 2 : index
    %c0_20 = arith.constant 0 : index
    %15 = vector.load %arg1[%c0_17, %c1_18, %c2_19, %c0_20] : memref<1x18x18x4xf32, #tpu.memory_space<vmem>>, vector<1x16x16x4xf32>
    %16 = vector.shape_cast %15 : vector<1x16x16x4xf32> to vector<16x16x4xf32>
    %17 = arith.truncf %16 : vector<16x16x4xf32> to vector<16x16x4xbf16>
    %c0_21 = arith.constant 0 : index
    %c2_22 = arith.constant 2 : index
    %c0_23 = arith.constant 0 : index
    %c0_24 = arith.constant 0 : index
    %18 = vector.load %arg1[%c0_21, %c2_22, %c0_23, %c0_24] : memref<1x18x18x4xf32, #tpu.memory_space<vmem>>, vector<1x16x16x4xf32>
    %19 = vector.shape_cast %18 : vector<1x16x16x4xf32> to vector<16x16x4xf32>
    %20 = arith.truncf %19 : vector<16x16x4xf32> to vector<16x16x4xbf16>
    %c0_25 = arith.constant 0 : index
    %c2_26 = arith.constant 2 : index
    %c1_27 = arith.constant 1 : index
    %c0_28 = arith.constant 0 : index
    %21 = vector.load %arg1[%c0_25, %c2_26, %c1_27, %c0_28] : memref<1x18x18x4xf32, #tpu.memory_space<vmem>>, vector<1x16x16x4xf32>
    %22 = vector.shape_cast %21 : vector<1x16x16x4xf32> to vector<16x16x4xf32>
    %23 = arith.truncf %22 : vector<16x16x4xf32> to vector<16x16x4xbf16>
    %c0_29 = arith.constant 0 : index
    %c2_30 = arith.constant 2 : index
    %c2_31 = arith.constant 2 : index
    %c0_32 = arith.constant 0 : index
    %24 = vector.load %arg1[%c0_29, %c2_30, %c2_31, %c0_32] : memref<1x18x18x4xf32, #tpu.memory_space<vmem>>, vector<1x16x16x4xf32>
    %25 = vector.shape_cast %24 : vector<1x16x16x4xf32> to vector<16x16x4xf32>
    %26 = arith.truncf %25 : vector<16x16x4xf32> to vector<16x16x4xbf16>
    %27 = tpu.concatenate %2, %5, %8, %11, %14, %17, %20, %23, %26 in 2 : vector<16x16x4xbf16>, vector<16x16x4xbf16>, vector<16x16x4xbf16>, vector<16x16x4xbf16>, vector<16x16x4xbf16>, vector<16x16x4xbf16>, vector<16x16x4xbf16>, vector<16x16x4xbf16>, vector<16x16x4xbf16> -> vector<16x16x36xbf16>
    %28 = vector.shape_cast %27 : vector<16x16x36xbf16> to vector<256x36xbf16>
    %c0_33 = arith.constant 0 : index
    %c0_34 = arith.constant 0 : index
    %29 = vector.load %arg2[%c0_33, %c0_34] : memref<36x4xbf16, #tpu.memory_space<vmem>>, vector<36x4xbf16>
    %cst = arith.constant dense<0.000000e+00> : vector<256x4xf32>
    %30 = tpu.matmul %28, %29, %cst {dimension_numbers = #tpu.dot_dimension_numbers<[1], [0], [0], [1], [0, 0, 1, 1], [], []>} : vector<256x36xbf16>, vector<36x4xbf16>, vector<256x4xf32> -> vector<256x4xf32>
    %c0_35 = arith.constant 0 : index
    %c0_36 = arith.constant 0 : index
    %c0_37 = arith.constant 0 : index
    %31 = vector.load %arg3[%c0_35, %c0_36, %c0_37] : memref<1x256x4xf32, #tpu.memory_space<vmem>>, vector<1x256x4xf32>
    %32 = vector.shape_cast %31 : vector<1x256x4xf32> to vector<256x4xf32>
    %33 = vector.shape_cast %30 : vector<256x4xf32> to vector<1x256x4xf32>
    tpu.vector_store %arg3[%c0_35, %c0_36, %c0_37], %33 {strides = array<i32>} : memref<1x256x4xf32, #tpu.memory_space<vmem>>, vector<1x256x4xf32>,
    %cst_38 = arith.constant dense<0.000000e+00> : vector<4xf32>
    %34 = vector.multi_reduction <add>, %30, %cst_38 [0] : vector<256x4xf32> to vector<4xf32>
    %35 = vector.shape_cast %34 : vector<4xf32> to vector<1x4xf32>
    %36 = arith.mulf %30, %30 : vector<256x4xf32>
    %cst_39 = arith.constant dense<0.000000e+00> : vector<4xf32>
    %37 = vector.multi_reduction <add>, %36, %cst_39 [0] : vector<256x4xf32> to vector<4xf32>
    %38 = vector.shape_cast %37 : vector<4xf32> to vector<1x4xf32>
    %39 = tpu.concatenate %35, %38 in 0 : vector<1x4xf32>, vector<1x4xf32> -> vector<2x4xf32>
    %c0_40 = arith.constant 0 : index
    %c0_41 = arith.constant 0 : index
    %c0_42 = arith.constant 0 : index
    %40 = vector.load %arg4[%c0_40, %c0_41, %c0_42] : memref<1x2x4xf32, #tpu.memory_space<vmem>>, vector<1x2x4xf32>
    %41 = vector.shape_cast %40 : vector<1x2x4xf32> to vector<2x4xf32>
    %42 = vector.shape_cast %39 : vector<2x4xf32> to vector<1x2x4xf32>
    tpu.vector_store %arg4[%c0_40, %c0_41, %c0_42], %42 {strides = array<i32>} : memref<1x2x4xf32, #tpu.memory_space<vmem>>, vector<1x2x4xf32>,
    return
  }
  func.func @transform_0(%arg0: i32) -> (i32, i32, i32, i32) {
    %c0_i32 = arith.constant 0 : i32
    %c0_i32_0 = arith.constant 0 : i32
    %c0_i32_1 = arith.constant 0 : i32
    %c0_i32_2 = arith.constant 0 : i32
    return %arg0, %c0_i32, %c0_i32_0, %c0_i32_1 : i32, i32, i32, i32
  }
  func.func @transform_1(%arg0: i32) -> (i32, i32) {
    %c0_i32 = arith.constant 0 : i32
    %c0_i32_0 = arith.constant 0 : i32
    %c0_i32_1 = arith.constant 0 : i32
    return %c0_i32, %c0_i32_0 : i32, i32
  }
  func.func @transform_2(%arg0: i32) -> (i32, i32, i32) {
    %c0_i32 = arith.constant 0 : i32
    %c0_i32_0 = arith.constant 0 : i32
    %c0_i32_1 = arith.constant 0 : i32
    return %arg0, %c0_i32, %c0_i32_0 : i32, i32, i32
  }
  func.func @transform_3(%arg0: i32) -> (i32, i32, i32) {
    %c0_i32 = arith.constant 0 : i32
    %c0_i32_0 = arith.constant 0 : i32
    %c0_i32_1 = arith.constant 0 : i32
    return %arg0, %c0_i32, %c0_i32_0 : i32, i32, i32
  }
}

</mosaic_0001>

<bundles_post_ra>
// kernel: tpu_custom_call.1
= control target key start
LH: loop header
LB: loop body
LE: loop exit
PB: predicated region body
PF: predicated region fallthrough
CT: control target
= control target key end

     0   :  { %9 = vsyncpa [#allocation3], 0  ;;  %s2946_s0 = inlined_call_operand.vmem [shape: f32[2,18,18,4], index: 0, kind: input, shape index: {}]   ;;  %s2947_s1 = inlined_call_operand.vmem [shape: bf16[36,4], index: 1, kind: input, shape index: {}]   ;;  %s2948_s2 = inlined_call_operand.vmem [shape: f32[2,256,4], index: 2, kind: output, shape index: {0}]   ;;  %s2949_s3 = inlined_call_operand.hbm [shape: f32[2,2,4], index: 3, kind: output, shape index: {1}]  }
   0x1   :  { %11 = vsyncpa [#allocation3 + $0x1], 0  ;;  %s2244_s12 = smov 0   ;;  %s2246_s13 = smov 0  }
   0x2   :  { %s2248_s14 = smov 0   ;;  %s2250_s15 = smov 0  }
   0x3 LB: > { %s2265_s16 = sadd.s32 4294967295, %s2213_s15   ;;  %s1811_s17 = sadd.s32 4294967294, %s2213_s15   ;;  %s2213_s15 = sphi %s2250_s15, %s2955_s15   ;;  %s2209_s14 = sphi %s2248_s14, %s2954_s14   ;;  %s2205_s13 = sphi %s2246_s13, %s2953_s13   ;;  %s2201_s12 = sphi %s2244_s12, %s2952_s12  }
   0x4   : > { %s2269_s18 = sadd.s32 1, %s2213_s15   ;;  %s97_s19 = sadd.s32 1, %s2209_s14 }
   0x5   : > { %s94_s20 = ssub.s32 %s2213_s15, %s2269_s18  ;;  %p107_p0 = scmp.ne.s32.totalorder %s2209_s14, %s2205_s13 }
   0x6   : > { %p95_p1 = scmp.eq.s32.totalorder %s94_s20, 0  ;;  %p108_p2 = scmp.eq.s32.totalorder %s2265_s16, 1 }
   0x7   : > { %p113_p3 = scmp.ne.s32.totalorder %s2205_s13, %s2201_s12  ;;  %p114_p4 = scmp.eq.s32.totalorder %s1811_s17, 1 }
   0x8   : > { %s2280_s21 = scalar_select %p95_p1, %s2209_s14, %s97_s19  }
   0x9   : > { %p2282_p5 = por %p108_p2, %p107_p0  ;;  %p2286_p6 = por %p114_p4, %p113_p3 }
   0xa   : > { %p1814_p7 = scmp.ge.s32.totalorder %s2213_s15, 1  ;;  %p143_p8 = scmp.lt.s32.totalorder %s2213_s15, 3 }
   0xc   : > { %p144_p9 = pnand %p1814_p7, %p143_p8 }
   0xd   : > { %p172_p10 = scmp.lt.s32.totalorder (!%p144_p9), %s2265_s16, 1  ;;  %s2215_s29 = smov (!%p144_p9), 8   ;;  %v2148_v29 = vld [vmem:[%s2947_s1] sm:$0xff] (!%p144_p9)   ;;  %v2149_v30 = vld [vmem:[%s2947_s1 + $0x8] sm:$0xff] (!%p144_p9)   ;;  %vm1334_vm0 = vcmask (!%p144_p9), 1041408   ;;  %vm1001_vm1 = vcmask (!%p144_p9), 31744  }
   0xe   : > { %147 = sbr.rel (%p144_p9) target bundleno = 650 (0x28a), region = 28  ;;  %s2216_s30 = smov (!%p144_p9), 4   ;;  %2054 = vmatprep.subr.bf16.mxu0 (!%p144_p9), %v2148_v29  ;;  %2092 = vmatprep.subr.bf16.mxu1 (!%p144_p9), %v2148_v29  ;;  %v2150_v32 = vld [vmem:[%s2947_s1 + $0x10] ss:$0 sps:$4 sm:$0x33] (!%p144_p9)   ;;  %vm1050_vm2 = vcmask (!%p144_p9), 64512  }
   0xf   : > { %s2217_s4 = smov (!%p144_p9), 12   ;;  %s2218_s5 = smov (!%p144_p9), 16   ;;  %2055 = vmatpush3.bf16.msra.mxu0 (!%p144_p9), %v2148_v29  ;;  %2095 = vmatpush3.bf16.msra.mxu1 (!%p144_p9), %v2148_v29  ;;  %v1336_v33 = vsel (!%p144_p9), %vm1334_vm0, %v2150_v32, 0  ;;  %vm1083_vm3 = vcmask (!%p144_p9), 97280   ;;  %vm1116_vm4 = vcmask (!%p144_p9), 130048   ;;  %vm1149_vm5 = vcmask (!%p144_p9), 162816  }
  0x10   : > { %s2219_s6 = smov (!%p144_p9), 20   ;;  %s2220_s11 = smov (!%p144_p9), 24   ;;  %2056 = vmatprep.subr.bf16.mxu0 (!%p144_p9), %v2149_v30  ;;  %2093 = vmatprep.subr.bf16.mxu1 (!%p144_p9), %v2149_v30  ;;  %vm1182_vm6 = vcmask (!%p144_p9), 195584   ;;  %vm1215_vm7 = vcmask (!%p144_p9), 228352   ;;  %vm1248_vm8 = vcmask (!%p144_p9), 261120   ;;  %vm1301_vm9 = vcmask (!%p144_p9), 293888  }
  0x11   : > { %s2221_s20 = smov (!%p144_p9), 28   ;;  %vm1701_vm10 = vcmask (!%p144_p9), 1040384   ;;  %vm1703_vm11 = vcmask (!%p144_p9), 25600  }
  0x13   : > { %2057 = vmatpush3.bf16.msra.mxu0 (!%p144_p9), %v2149_v30  ;;  %2096 = vmatpush3.bf16.msra.mxu1 (!%p144_p9), %v2149_v30 }
  0x14   : > { %2098 = vmatprep.subr.msk.bf16.mxu0 (!%p144_p9), %vm1334_vm0, %v2150_v32  ;;  %2099 = vmatprep.subr.msk.bf16.mxu1 (!%p144_p9), %vm1334_vm0, %v2150_v32 }
  0x15   : > { %s2294_s24 = scalar_select %p172_p10, %s2265_s16, 1 }
  0x17   : > { %s2100_s25 = smul.u32 432, %s2294_s24  ;;  %2059 = vmatpush3.bf16.msra.mxu0 %v1336_v33  ;;  %2097 = vmatpush3.bf16.msra.mxu1 %v1336_v33  ;;  %s2034_s26 = sshll.u32 %s2294_s24, 8 }
  0x18   : > { %s169_s24 = sand.u32 1, %s2205_s13  }
  0x19   : > { %s2300_s28 = scalar_lea.vmem %s2946_s0, %s2100_s25  ;;  %s2222_s25 = smov 32  }
  0x1a   : > { %v279_v0 = vld [vmem:[%s2300_s28 + $0x2] sm:$0xff]  ;;  %v280_v1 = vld [vmem:[%s2300_s28 + $0xa] sm:$0xff]  ;;  %v281_v5 = vld [vmem:[%s2300_s28 + $0x1a] sm:$0xff]  ;;  %s1711_s10 = scalar_lea.sflag [#allocation3], %s169_s24 }
  0x1b   : > { %v231_v2 = vld [vmem:[%s2300_s28 + $0x1] sm:$0xff]  ;;  %v311_v3 = vpack.c.bf16 %v280_v1, %v279_v0  ;;  %v232_v4 = vld [vmem:[%s2300_s28 + $0x9] sm:$0xff]  ;;  %v233_v8 = vld [vmem:[%s2300_s28 + $0x19] sm:$0xff] }
  0x1c   : > { %v282_v6 = vld [vmem:[%s2300_s28 + $0x22] sm:$0xff]  ;;  %v263_v7 = vpack.c.bf16 %v232_v4, %v231_v2  ;;  %v1821_v12 = vld [vmem:[%s2300_s28 + $0x30] sm:$0xff]  ;;  %v1822_v13 = vld [vmem:[%s2300_s28 + $0x38] sm:$0xff] }
  0x1d   : > { %v234_v9 = vld [vmem:[%s2300_s28 + $0x21] sm:$0xff]  ;;  %681 = vrot.lane.b32.xlu1 %v311_v3, %s2215_s29  ;;  %v312_v10 = vpack.c.bf16 %v282_v6, %v281_v5  ;;  %v1819_v14 = vld [vmem:[%s2300_s28 + $0x18] sm:$0xff]  ;;  %v2317_v16 = vpack.c.bf16 %v1822_v13, %v1821_v12  ;;  %v1918_v25 = vld [vmem:[%s2300_s28 + $0x50] sm:$0xff] }
  0x1e   : > { %633 = vrot.lane.b32.xlu0 %v263_v7, %s2216_s30  ;;  %v264_v11 = vpack.c.bf16 %v234_v9, %v233_v8  ;;  %v1820_v15 = vld [vmem:[%s2300_s28 + $0x20] sm:$0xff]  ;;  %v1853_v18 = vld [vmem:[%s2300_s28 + $0x31] sm:$0xff]  ;;  %v1917_v24 = vld [vmem:[%s2300_s28 + $0x48] sm:$0xff] }
  0x1f   : > { %v2320_v17 = vpack.c.bf16 %v1820_v15, %v1819_v14  ;;  %v1854_v19 = vld [vmem:[%s2300_s28 + $0x39] sm:$0xff]  ;;  %v2335_v26 = vpack.c.bf16 %v1918_v25, %v1917_v24  ;;  %v1949_v27 = vld [vmem:[%s2300_s28 + $0x49] sm:$0xff]  ;;  %v1950_v28 = vld [vmem:[%s2300_s28 + $0x51] sm:$0xff] }
  0x20   : > { %v409_v20 = vpack.c.bf16 %v1854_v19, %v1853_v18  ;;  %v1885_v21 = vld [vmem:[%s2300_s28 + $0x32] sm:$0xff]  ;;  %v1886_v22 = vld [vmem:[%s2300_s28 + $0x3a] sm:$0xff]  ;;  %v554_v31 = vpack.c.bf16 %v1950_v28, %v1949_v27  ;;  %v1981_v34 = vld [vmem:[%s2300_s28 + $0x4a] sm:$0xff] }
  0x21   : > { %683 = vrot.lane.b32.xlu1 %v312_v10, %s2215_s29  ;;  %v457_v23 = vpack.c.bf16 %v1886_v22, %v1885_v21  ;;  %v1982_v35 = vld [vmem:[%s2300_s28 + $0x52] sm:$0xff]  ;;  %v1825_v37 = vld [vmem:[%s2300_s28 + $0x60] sm:$0xff]  ;;  %v1826_v38 = vld [vmem:[%s2300_s28 + $0x68] sm:$0xff] }
  0x22   : > { %635 = vrot.lane.b32.xlu0 %v264_v11, %s2216_s30  ;;  %v602_v36 = vpack.c.bf16 %v1982_v35, %v1981_v34  ;;  %v2364_v39 = vpack.c.bf16 %v1826_v38, %v1825_v37  ;;  %v1857_v40 = vld [vmem:[%s2300_s28 + $0x61] sm:$0xff]  ;;  %v1858_v41 = vld [vmem:[%s2300_s28 + $0x69] sm:$0xff]  ;;  %v1921_v46 = vld [vmem:[%s2300_s28 + $0x78] sm:$0xff] }
  0x23   : > { %v411_v42 = vpack.c.bf16 %v1858_v41, %v1857_v40  ;;  %v1889_v43 = vld [vmem:[%s2300_s28 + $0x62] sm:$0xff]  ;;  %v1890_v44 = vld [vmem:[%s2300_s28 + $0x6a] sm:$0xff]  ;;  %v1953_v49 = vld [vmem:[%s2300_s28 + $0x79] sm:$0xff] }
  0x24   : > { %v459_v45 = vpack.c.bf16 %v1890_v44, %v1889_v43  ;;  %v1922_v47 = vld [vmem:[%s2300_s28 + $0x80] sm:$0xff]  ;;  %v1829_v55 = vld [vmem:[%s2300_s28 + $0x90] sm:$0xff]  ;;  %v1830_v56 = vld [vmem:[%s2300_s28 + $0x98] sm:$0xff] }
  0x25   : > { %731 = vrot.lane.b32.xlu1 %v2317_v16, %s2217_s4  ;;  %v2380_v48 = vpack.c.bf16 %v1922_v47, %v1921_v46  ;;  %v1954_v50 = vld [vmem:[%s2300_s28 + $0x81] sm:$0xff]  ;;  %v2400_v57 = vpack.c.bf16 %v1830_v56, %v1829_v55  ;;  %v1861_v58 = vld [vmem:[%s2300_s28 + $0x91] sm:$0xff]  ;;  %v1862_v59 = vld [vmem:[%s2300_s28 + $0x99] sm:$0xff] }
  0x26   : > { %729 = vrot.lane.b32.xlu0 %v2320_v17, %s2217_s4  ;;  %v556_v51 = vpack.c.bf16 %v1954_v50, %v1953_v49  ;;  %v1985_v52 = vld [vmem:[%s2300_s28 + $0x7a] sm:$0xff]  ;;  %v1986_v53 = vld [vmem:[%s2300_s28 + $0x82] sm:$0xff]  ;;  %v413_v60 = vpack.c.bf16 %v1862_v59, %v1861_v58  ;;  %v1893_v61 = vld [vmem:[%s2300_s28 + $0x92] sm:$0xff] }
  0x27   : > { %v604_v54 = vpack.c.bf16 %v1986_v53, %v1985_v52  ;;  %v1894_v62 = vld [vmem:[%s2300_s28 + $0x9a] sm:$0xff]  ;;  %v1925_v0 = vld [vmem:[%s2300_s28 + $0xa8] sm:$0xff]  ;;  %v1926_v1 = vld [vmem:[%s2300_s28 + $0xb0] sm:$0xff] }
  0x28   : > { %v461_v63 = vpack.c.bf16 %v1894_v62, %v1893_v61  ;;  %v2416_v2 = vpack.c.bf16 %v1926_v1, %v1925_v0  ;;  %v1957_v3 = vld [vmem:[%s2300_s28 + $0xa9] sm:$0xff]  ;;  %v1958_v4 = vld [vmem:[%s2300_s28 + $0xb1] sm:$0xff]  ;;  %v1833_v9 = vld [vmem:[%s2300_s28 + $0xc0] sm:$0xff] }
  0x29   : > { %779 = vrot.lane.b32.xlu1 %v409_v20, %s2218_s5  ;;  %v558_v5 = vpack.c.bf16 %v1958_v4, %v1957_v3  ;;  %v1989_v6 = vld [vmem:[%s2300_s28 + $0xaa] sm:$0xff]  ;;  %v1990_v7 = vld [vmem:[%s2300_s28 + $0xb2] sm:$0xff]  ;;  %v1865_v12 = vld [vmem:[%s2300_s28 + $0xc1] sm:$0xff] }
  0x2a   : > { %777 = vrot.lane.b32.xlu0 %v264_v11, %s2218_s5  ;;  %v606_v8 = vpack.c.bf16 %v1990_v7, %v1989_v6  ;;  %v1866_v13 = vld [vmem:[%s2300_s28 + $0xc9] sm:$0xff]  ;;  %v1930_v21 = vld [vmem:[%s2300_s28 + $0xe0] sm:$0xff]  ;;  %v1869_v47 = vld [vmem:[%s2300_s28 + $0xf1] sm:$0xff] }
  0x2b   : > { %v415_v14 = vpack.c.bf16 %v1866_v13, %v1865_v12  ;;  %v1897_v15 = vld [vmem:[%s2300_s28 + $0xc2] sm:$0xff]  ;;  %v1898_v18 = vld [vmem:[%s2300_s28 + $0xca] sm:$0xff]  ;;  %v1993_v32 = vld [vmem:[%s2300_s28 + $0xda] sm:$0xff] }
  0x2c   : > { %v463_v19 = vpack.c.bf16 %v1898_v18, %v1897_v15  ;;  %v1962_v24 = vld [vmem:[%s2300_s28 + $0xe1] sm:$0xff]  ;;  %v1837_v41 = vld [vmem:[%s2300_s28 + $0xf0] sm:$0xff]  ;;  %v1870_v49 = vld [vmem:[%s2300_s28 + $0xf9] sm:$0xff] }
  0x2d   : > { %827 = vrot.lane.b32.xlu1 %v457_v23, %s2219_s6  ;;  %v1994_v33 = vld [vmem:[%s2300_s28 + $0xe2] sm:$0xff]  ;;  %v417_v53 = vpack.c.bf16 %v1870_v49, %v1869_v47  ;;  %v1902_v55 = vld [vmem:[%s2300_s28 + $0xfa] sm:$0xff]  ;;  %v1934_v3 = vld [vmem:[%s2300_s28 + $0x110] sm:$0xff] }
  0x2e   : > { %825 = vrot.lane.b32.xlu0 %v312_v10, %s2219_s6  ;;  %v1834_v10 = vld [vmem:[%s2300_s28 + $0xc8] sm:$0xff]  ;;  %v608_v35 = vpack.c.bf16 %v1994_v33, %v1993_v32  ;;  %v183_v38 = vld [vmem:[%s2300_s28] sm:$0xff]  ;;  %v1966_v15 = vld [vmem:[%s2300_s28 + $0x111] sm:$0xff] }
  0x2f   : > { %v2436_v11 = vpack.c.bf16 %v1834_v10, %v1833_v9  ;;  %v184_v40 = vld [vmem:[%s2300_s28 + $0x8] sm:$0xff] }
  0x30   : > { %v215_v44 = vpack.c.bf16 %v184_v40, %v183_v38  ;;  %v1933_v1 = vld [vmem:[%s2300_s28 + $0x108] sm:$0xff] }
  0x31   : > { %875 = vrot.lane.b32.xlu1 %v2335_v26, %s2220_s11  ;;  %v2503_v12 = vpack.c.bf16 %v1934_v3, %v1933_v1  ;;  %v1905_v49 = vld [vmem:[%s2300_s28 + $0x122] sm:$0xff] }
  0x32   : > { %873 = vrot.lane.b32.xlu0 %v2317_v16, %s2220_s11 }
  0x35   : > { %923 = vrot.lane.b32.xlu1 %v554_v31, %s2221_s20 }
  0x36   : > { %921 = vrot.lane.b32.xlu0 %v409_v20, %s2221_s20 }
  0x39   : > { %637 = vrot.lane.b32.xlu1 %v409_v20, %s2216_s30  ;;  %v1929_v20 = vld [vmem:[%s2300_s28 + $0xd8] sm:$0xff] }
  0x3a   : > { %969 = vrot.lane.b32.xlu0 %v457_v23, %s2222_s25  ;;  %v2452_v22 = vpack.c.bf16 %v1930_v21, %v1929_v20 }
  0x3d   : > { %639 = vrot.lane.b32.xlu1 %v554_v31, %s2216_s30 }
  0x3e   : > { %971 = vrot.lane.b32.xlu0 %v602_v36, %s2222_s25 }
  0x41   : > { %687 = vrot.lane.b32.xlu1 %v602_v36, %s2215_s29 }
  0x42   : > { %685 = vrot.lane.b32.xlu0 %v457_v23, %s2215_s29  ;;  %v1961_v23 = vld [vmem:[%s2300_s28 + $0xd9] sm:$0xff] }
  0x43   : > { %v560_v28 = vpack.c.bf16 %v1962_v24, %v1961_v23 }
  0x45   : > { %735 = vrot.lane.b32.xlu1 %v2364_v39, %s2217_s4 }
  0x46   : > { %733 = vrot.lane.b32.xlu0 %v2335_v26, %s2217_s4 }
  0x49   : > { %783 = vrot.lane.b32.xlu1 %v411_v42, %s2218_s5 }
  0x4a   : > { %781 = vrot.lane.b32.xlu0 %v554_v31, %s2218_s5 }
  0x4d   : > { %831 = vrot.lane.b32.xlu1 %v459_v45, %s2219_s6 }
  0x4e   : > { %829 = vrot.lane.b32.xlu0 %v602_v36, %s2219_s6 }
  0x51   : > { %879 = vrot.lane.b32.xlu1 %v2380_v48, %s2220_s11 }
  0x52   : > { %877 = vrot.lane.b32.xlu0 %v2364_v39, %s2220_s11 }
  0x55   : > { %927 = vrot.lane.b32.xlu1 %v556_v51, %s2221_s20 }
  0x56   : > { %925 = vrot.lane.b32.xlu0 %v411_v42, %s2221_s20 }
  0x59   : > { %641 = vrot.lane.b32.xlu1 %v411_v42, %s2216_s30  ;;  %v1838_v42 = vld [vmem:[%s2300_s28 + $0xf8] sm:$0xff] }
  0x5a   : > { %973 = vrot.lane.b32.xlu0 %v459_v45, %s2222_s25  ;;  %v2474_v46 = vpack.c.bf16 %v1838_v42, %v1837_v41  ;;  %v1873_v41 = vld [vmem:[%s2300_s28 + $0x121] sm:$0xff]  ;;  %v1874_v42 = vld [vmem:[%s2300_s28 + $0x129] sm:$0xff] }
  0x5d   : > { %643 = vrot.lane.b32.xlu1 %v556_v51, %s2216_s30 }
  0x5e   : > { %975 = vrot.lane.b32.xlu0 %v604_v54, %s2222_s25 }
  0x61   : > { %691 = vrot.lane.b32.xlu1 %v604_v54, %s2215_s29 }
  0x62   : > { %689 = vrot.lane.b32.xlu0 %v459_v45, %s2215_s29 }
  0x65   : > { %739 = vrot.lane.b32.xlu1 %v2400_v57, %s2217_s4 }
  0x66   : > { %737 = vrot.lane.b32.xlu0 %v2380_v48, %s2217_s4 }
  0x69   : > { %787 = vrot.lane.b32.xlu1 %v413_v60, %s2218_s5 }
  0x6a   : > { %785 = vrot.lane.b32.xlu0 %v556_v51, %s2218_s5 }
  0x6d   : > { %835 = vrot.lane.b32.xlu1 %v461_v63, %s2219_s6 }
  0x6e   : > { %833 = vrot.lane.b32.xlu0 %v604_v54, %s2219_s6  ;;  %v1901_v54 = vld [vmem:[%s2300_s28 + $0xf2] sm:$0xff] }
  0x71   : > { %883 = vrot.lane.b32.xlu1 %v2416_v2, %s2220_s11 }
  0x72   : > { %881 = vrot.lane.b32.xlu0 %v2400_v57, %s2220_s11 }
  0x75   : > { %931 = vrot.lane.b32.xlu1 %v558_v5, %s2221_s20 }
  0x76   : > { %929 = vrot.lane.b32.xlu0 %v413_v60, %s2221_s20 }
  0x79   : > { %645 = vrot.lane.b32.xlu1 %v413_v60, %s2216_s30 }
  0x7a   : > { %977 = vrot.lane.b32.xlu0 %v461_v63, %s2222_s25 }
  0x7d   : > { %647 = vrot.lane.b32.xlu1 %v558_v5, %s2216_s30 }
  0x7e   : > { %979 = vrot.lane.b32.xlu0 %v606_v8, %s2222_s25 }
  0x81   : > { %695 = vrot.lane.b32.xlu1 %v606_v8, %s2215_s29 }
  0x82   : > { %693 = vrot.lane.b32.xlu0 %v461_v63, %s2215_s29  ;;  %v465_v63 = vpack.c.bf16 %v1902_v55, %v1901_v54 }
  0x85   : > { %743 = vrot.lane.b32.xlu1 %v2436_v11, %s2217_s4 }
  0x86   : > { %741 = vrot.lane.b32.xlu0 %v2416_v2, %s2217_s4 }
  0x89   : > { %791 = vrot.lane.b32.xlu1 %v415_v14, %s2218_s5 }
  0x8a   : > { %789 = vrot.lane.b32.xlu0 %v558_v5, %s2218_s5 }
  0x8d   : > { %839 = vrot.lane.b32.xlu1 %v463_v19, %s2219_s6 }
  0x8e   : > { %837 = vrot.lane.b32.xlu0 %v606_v8, %s2219_s6 }
  0x8f   : > { %v682_v25 = vpop.permute.xlu1 %681 }
  0x90   : > { %v634_v27 = vpop.permute.xlu0 %633 }
  0x91   : > { %887 = vrot.lane.b32.xlu1 %v2452_v22, %s2220_s11  ;;  %v1004_v51 = vsel %vm1001_vm1, %v215_v44, %v634_v27 }
  0x92   : > { %885 = vrot.lane.b32.xlu0 %v2436_v11, %s2220_s11  ;;  %v1052_v56 = vsel %vm1050_vm2, %v1004_v51, %v682_v25 }
  0x93   : > { %v684_v29 = vpop.permute.xlu1 %683 }
  0x94   : > { %v636_v30 = vpop.permute.xlu0 %635 }
  0x95   : > { %935 = vrot.lane.b32.xlu1 %v560_v28, %s2221_s20  ;;  %v1007_v59 = vsel %vm1001_vm1, %v2320_v17, %v636_v30  ;;  %v1998_v30 = vld [vmem:[%s2300_s28 + $0x112] sm:$0xff] }
  0x96   : > { %933 = vrot.lane.b32.xlu0 %v415_v14, %s2221_s20  ;;  %v1054_v17 = vsel %vm1050_vm2, %v1007_v59, %v684_v29  ;;  %v1997_v29 = vld [vmem:[%s2300_s28 + $0x10a] sm:$0xff]  ;;  %v1937_v59 = vld [vmem:[%s2300_s28 + $0x138] sm:$0xff] }
  0x97   : > { %v732_v31 = vpop.permute.xlu1 %731  ;;  %v610_v32 = vpack.c.bf16 %v1998_v30, %v1997_v29  ;;  %v1845_v29 = vld [vmem:[%s2300_s28 + $0x150] sm:$0xff]  ;;  %v1846_v30 = vld [vmem:[%s2300_s28 + $0x158] sm:$0xff] }
  0x98   : > { %v730_v34 = vpop.permute.xlu0 %729  ;;  %v1087_v6 = vsel %vm1083_vm3, %v1054_v17, %v732_v31 }
  0x99   : > { %649 = vrot.lane.b32.xlu1 %v415_v14, %s2216_s30  ;;  %v1085_v60 = vsel %vm1083_vm3, %v1052_v56, %v730_v34  ;;  %v1965_v14 = vld [vmem:[%s2300_s28 + $0x109] sm:$0xff] }
  0x9a   : > { %981 = vrot.lane.b32.xlu0 %v463_v19, %s2222_s25  ;;  %v562_v24 = vpack.c.bf16 %v1966_v15, %v1965_v14 }
  0x9b   : > { %v780_v36 = vpop.permute.xlu1 %779 }
  0x9c   : > { %v778_v37 = vpop.permute.xlu0 %777  ;;  %v1120_v9 = vsel %vm1116_vm4, %v1087_v6, %v780_v36  ;;  %v1842_v36 = vld [vmem:[%s2300_s28 + $0x128] sm:$0xff]  ;;  %v1969_v6 = vld [vmem:[%s2300_s28 + $0x139] sm:$0xff] }
  0x9d   : > { %651 = vrot.lane.b32.xlu1 %v560_v28, %s2216_s30  ;;  %v1118_v62 = vsel %vm1116_vm4, %v1085_v60, %v778_v37  ;;  %v1938_v60 = vld [vmem:[%s2300_s28 + $0x140] sm:$0xff] }
  0x9e   : > { %983 = vrot.lane.b32.xlu0 %v608_v35, %s2222_s25 }
  0x9f   : > { %v828_v43 = vpop.permute.xlu1 %827 }
  0xa0   : > { %v826_v45 = vpop.permute.xlu0 %825  ;;  %v1153_v13 = vsel %vm1149_vm5, %v1120_v9, %v828_v43 }
  0xa1   : > { %699 = vrot.lane.b32.xlu1 %v608_v35, %s2215_s29  ;;  %v1151_v0 = vsel %vm1149_vm5, %v1118_v62, %v826_v45  ;;  %v419_v45 = vpack.c.bf16 %v1874_v42, %v1873_v41  ;;  %v1909_v42 = vld [vmem:[%s2300_s28 + $0x152] sm:$0xff] }
  0xa2   : > { %697 = vrot.lane.b32.xlu0 %v463_v19, %s2215_s29 }
  0xa3   : > { %v876_v50 = vpop.permute.xlu1 %875 }
  0xa4   : > { %v874_v52 = vpop.permute.xlu0 %873  ;;  %v1186_v18 = vsel %vm1182_vm6, %v1153_v13, %v876_v50  ;;  %v1906_v50 = vld [vmem:[%s2300_s28 + $0x12a] sm:$0xff] }
  0xa5   : > { %747 = vrot.lane.b32.xlu1 %v2474_v46, %s2217_s4  ;;  %v1184_v4 = vsel %vm1182_vm6, %v1151_v0, %v874_v52  ;;  %v467_v56 = vpack.c.bf16 %v1906_v50, %v1905_v49 }
  0xa6   : > { %745 = vrot.lane.b32.xlu0 %v2452_v22, %s2217_s4 }
  0xa7   : > { %v924_v58 = vpop.permute.xlu1 %923 }
  0xa8   : > { %v922_v61 = vpop.permute.xlu0 %921  ;;  %v1219_v20 = vsel %vm1215_vm7, %v1186_v18, %v924_v58 }
  0xa9   : > { %795 = vrot.lane.b32.xlu1 %v417_v53, %s2218_s5  ;;  %v1217_v7 = vsel %vm1215_vm7, %v1184_v4, %v922_v61  ;;  %v2559_v4 = vpack.c.bf16 %v1938_v60, %v1937_v59 }
  0xaa   : > { %793 = vrot.lane.b32.xlu0 %v560_v28, %s2218_s5 }
  0xab   : > { %v638_v5 = vpop.permute.xlu1 %637 }
  0xac   : > { %v970_v8 = vpop.permute.xlu0 %969  ;;  %v1010_v47 = vsel %vm1001_vm1, %v2317_v16, %v638_v5 }
  0xad   : > { %843 = vrot.lane.b32.xlu1 %v465_v63, %s2219_s6  ;;  %v1250_v10 = vsel %vm1248_vm8, %v1217_v7, %v970_v8  ;;  %v1970_v7 = vld [vmem:[%s2300_s28 + $0x141] sm:$0xff] }
  0xae   : > { %841 = vrot.lane.b32.xlu0 %v608_v35, %s2219_s6  ;;  %2060 = vmatprep.mubr.msk.bf16.mxu0 %vm1301_vm9, %v1250_v10  ;;  %v1841_v35 = vld [vmem:[%s2300_s28 + $0x120] sm:$0xff]  ;;  %v564_v15 = vpack.c.bf16 %v1970_v7, %v1969_v6 }
  0xaf   : > { %v640_v19 = vpop.permute.xlu1 %639  ;;  %v2529_v40 = vpack.c.bf16 %v1842_v36, %v1841_v35  ;;  %v1878_v35 = vld [vmem:[%s2300_s28 + $0x159] sm:$0xff] }
  0xb0   : > { %v972_v21 = vpop.permute.xlu0 %971  ;;  %v1013_v58 = vsel %vm1001_vm1, %v2335_v26, %v640_v19 }
  0xb1   : > { %v1252_v23 = vsel %vm1248_vm8, %v1219_v20, %v972_v21  ;;  %891 = vrot.lane.b32.xlu1 %v2503_v12, %s2220_s11  ;;  %v2001_v21 = vld [vmem:[%s2300_s28 + $0x13a] sm:$0xff] }
  0xb2   : > { %889 = vrot.lane.b32.xlu0 %v2474_v46, %s2220_s11  ;;  %2061 = vmatmul.mubr.msk.bf16.vlgmr.msra.gmra.mrb[0].mxu0 %vm1301_vm9, %v1252_v23  ;;  %v2002_v23 = vld [vmem:[%s2300_s28 + $0x142] sm:$0xff] }
  0xb3   : > { %v688_v25 = vpop.permute.xlu1 %687 }
  0xb4   : > { %v686_v27 = vpop.permute.xlu0 %685  ;;  %v1058_v61 = vsel %vm1050_vm2, %v1013_v58, %v688_v25  ;;  %v612_v25 = vpack.c.bf16 %v2002_v23, %v2001_v21  ;;  %v1849_v21 = vld [vmem:[%s2300_s28 + $0x180] sm:$0xff]  ;;  %v1850_v23 = vld [vmem:[%s2300_s28 + $0x188] sm:$0xff] }
  0xb5   : > { %939 = vrot.lane.b32.xlu1 %v562_v24, %s2221_s20  ;;  %v1056_v51 = vsel %vm1050_vm2, %v1010_v47, %v686_v27 }
  0xb6   : > { %937 = vrot.lane.b32.xlu0 %v417_v53, %s2221_s20 }
  0xb7   : > { %v736_v28 = vpop.permute.xlu1 %735 }
  0xb8   : > { %v734_v31 = vpop.permute.xlu0 %733  ;;  %v1091_v0 = vsel %vm1083_vm3, %v1058_v61, %v736_v28 }
  0xb9   : > { %653 = vrot.lane.b32.xlu1 %v417_v53, %s2216_s30  ;;  %v1089_v53 = vsel %vm1083_vm3, %v1056_v51, %v734_v31 }
  0xba   : > { %985 = vrot.lane.b32.xlu0 %v465_v63, %s2222_s25 }
  0xbb   : > { %v784_v33 = vpop.permute.xlu1 %783 }
  0xbc   : > { %v782_v34 = vpop.permute.xlu0 %781  ;;  %v1124_v26 = vsel %vm1116_vm4, %v1091_v0, %v784_v33  ;;  %v2585_v33 = vpack.c.bf16 %v1846_v30, %v1845_v29  ;;  %v1973_v0 = vld [vmem:[%s2300_s28 + $0x169] sm:$0xff] }
  0xbd   : > { %655 = vrot.lane.b32.xlu1 %v562_v24, %s2216_s30  ;;  %v1122_v55 = vsel %vm1116_vm4, %v1089_v53, %v782_v34  ;;  %v1877_v34 = vld [vmem:[%s2300_s28 + $0x151] sm:$0xff]  ;;  %v1941_v53 = vld [vmem:[%s2300_s28 + $0x168] sm:$0xff] }
  0xbe   : > { %987 = vrot.lane.b32.xlu0 %v610_v32, %s2222_s25  ;;  %v1882_v29 = vld [vmem:[%s2300_s28 + $0x189] sm:$0xff] }
  0xbf   : > { %v832_v37 = vpop.permute.xlu1 %831 }
  0xc0   : > { %v830_v38 = vpop.permute.xlu0 %829  ;;  %v1157_v5 = vsel %vm1149_vm5, %v1124_v26, %v832_v37 }
  0xc1   : > { %703 = vrot.lane.b32.xlu1 %v610_v32, %s2215_s29  ;;  %v1155_v16 = vsel %vm1149_vm5, %v1122_v55, %v830_v38  ;;  %v421_v38 = vpack.c.bf16 %v1878_v35, %v1877_v34  ;;  %v1913_v35 = vld [vmem:[%s2300_s28 + $0x182] sm:$0xff] }
  0xc2   : > { %701 = vrot.lane.b32.xlu0 %v465_v63, %s2215_s29 }
  0xc3   : > { %v880_v43 = vpop.permute.xlu1 %879 }
  0xc4   : > { %v878_v44 = vpop.permute.xlu0 %877  ;;  %v1190_v8 = vsel %vm1182_vm6, %v1157_v5, %v880_v43  ;;  %v1910_v43 = vld [vmem:[%s2300_s28 + $0x15a] sm:$0xff] }
  0xc5   : > { %751 = vrot.lane.b32.xlu1 %v2529_v40, %s2217_s4  ;;  %v1188_v62 = vsel %vm1182_vm6, %v1155_v16, %v878_v44  ;;  %v469_v51 = vpack.c.bf16 %v1910_v43, %v1909_v42 }
  0xc6   : > { %749 = vrot.lane.b32.xlu0 %v2503_v12, %s2217_s4 }
  0xc7   : > { %v928_v52 = vpop.permute.xlu1 %927 }
  0xc8   : > { %v926_v54 = vpop.permute.xlu0 %925  ;;  %v1223_v10 = vsel %vm1215_vm7, %v1190_v8, %v928_v52 }
  0xc9   : > { %799 = vrot.lane.b32.xlu1 %v419_v45, %s2218_s5  ;;  %v1221_v1 = vsel %vm1215_vm7, %v1188_v62, %v926_v54  ;;  %v1942_v54 = vld [vmem:[%s2300_s28 + $0x170] sm:$0xff] }
  0xca   : > { %797 = vrot.lane.b32.xlu0 %v562_v24, %s2218_s5  ;;  %v2615_v62 = vpack.c.bf16 %v1942_v54, %v1941_v53 }
  0xcb   : > { %v642_v63 = vpop.permute.xlu1 %641 }
  0xcc   : > { %v974_v3 = vpop.permute.xlu0 %973  ;;  %v1016_v41 = vsel %vm1001_vm1, %v2364_v39, %v642_v63 }
  0xcd   : > { %v1254_v17 = vsel %vm1248_vm8, %v1221_v1, %v974_v3  ;;  %847 = vrot.lane.b32.xlu1 %v467_v56, %s2219_s6  ;;  %v1974_v1 = vld [vmem:[%s2300_s28 + $0x171] sm:$0xff] }
  0xce   : > { %845 = vrot.lane.b32.xlu0 %v610_v32, %s2219_s6  ;;  %2064 = vmatprep.mubr.msk.bf16.mxu0 %vm1301_vm9, %v1254_v17  ;;  %v566_v7 = vpack.c.bf16 %v1974_v1, %v1973_v0 }
  0xcf   : > { %v644_v9 = vpop.permute.xlu1 %643 }
  0xd0   : > { %v976_v13 = vpop.permute.xlu0 %975  ;;  %v1019_v52 = vsel %vm1001_vm1, %v2380_v48, %v644_v9 }
  0xd1   : > { %v1256_v14 = vsel %vm1248_vm8, %v1223_v10, %v976_v13  ;;  %895 = vrot.lane.b32.xlu1 %v2559_v4, %s2220_s11  ;;  %v2005_v13 = vld [vmem:[%s2300_s28 + $0x16a] sm:$0xff] }
  0xd2   : > { %893 = vrot.lane.b32.xlu0 %v2529_v40, %s2220_s11  ;;  %2065 = vmatmul.mubr.msk.bf16.gmra.mrb[4].mxu0 %vm1301_vm9, %v1256_v14  ;;  %v2006_v14 = vld [vmem:[%s2300_s28 + $0x172] sm:$0xff] }
  0xd3   : > { %v692_v18 = vpop.permute.xlu1 %691 }
  0xd4   : > { %v690_v19 = vpop.permute.xlu0 %689  ;;  %v1062_v55 = vsel %vm1050_vm2, %v1019_v52, %v692_v18  ;;  %v614_v18 = vpack.c.bf16 %v2006_v14, %v2005_v13 }
  0xd5   : > { %943 = vrot.lane.b32.xlu1 %v564_v15, %s2221_s20  ;;  %v1060_v44 = vsel %vm1050_vm2, %v1016_v41, %v690_v19 }
  0xd6   : > { %941 = vrot.lane.b32.xlu0 %v419_v45, %s2221_s20 }
  0xd7   : > { %v740_v20 = vpop.permute.xlu1 %739 }
  0xd8   : > { %v738_v24 = vpop.permute.xlu0 %737  ;;  %v1095_v16 = vsel %vm1083_vm3, %v1062_v55, %v740_v20 }
  0xd9   : > { %657 = vrot.lane.b32.xlu1 %v419_v45, %s2216_s30  ;;  %v1093_v47 = vsel %vm1083_vm3, %v1060_v44, %v738_v24 }
  0xda   : > { %989 = vrot.lane.b32.xlu0 %v467_v56, %s2222_s25 }
  0xdb   : > { %v788_v27 = vpop.permute.xlu1 %787 }
  0xdc   : > { %v786_v28 = vpop.permute.xlu0 %785  ;;  %v1128_v48 = vsel %vm1116_vm4, %v1095_v16, %v788_v27  ;;  %v375_v27 = vpack.c.bf16 %v1850_v23, %v1849_v21  ;;  %v1977_v16 = vld [vmem:[%s2300_s28 + $0x199] sm:$0xff] }
  0xdd   : > { %659 = vrot.lane.b32.xlu1 %v564_v15, %s2216_s30  ;;  %v1126_v50 = vsel %vm1116_vm4, %v1093_v47, %v786_v28  ;;  %v1881_v28 = vld [vmem:[%s2300_s28 + $0x181] sm:$0xff]  ;;  %v1945_v47 = vld [vmem:[%s2300_s28 + $0x198] sm:$0xff] }
  0xde   : > { %991 = vrot.lane.b32.xlu0 %v612_v25, %s2222_s25 }
  0xdf   : > { %v836_v31 = vpop.permute.xlu1 %835 }
  0xe0   : > { %v834_v32 = vpop.permute.xlu0 %833  ;;  %v1161_v63 = vsel %vm1149_vm5, %v1128_v48, %v836_v31 }
  0xe1   : > { %707 = vrot.lane.b32.xlu1 %v612_v25, %s2215_s29  ;;  %v1159_v39 = vsel %vm1149_vm5, %v1126_v50, %v834_v32  ;;  %v423_v32 = vpack.c.bf16 %v1882_v29, %v1881_v28 }
  0xe2   : > { %705 = vrot.lane.b32.xlu0 %v467_v56, %s2215_s29 }
  0xe3   : > { %v884_v36 = vpop.permute.xlu1 %883 }
  0xe4   : > { %v882_v37 = vpop.permute.xlu0 %881  ;;  %v1194_v3 = vsel %vm1182_vm6, %v1161_v63, %v884_v36  ;;  %v1914_v36 = vld [vmem:[%s2300_s28 + $0x18a] sm:$0xff] }
  0xe5   : > { %755 = vrot.lane.b32.xlu1 %v2585_v33, %s2217_s4  ;;  %v1192_v56 = vsel %vm1182_vm6, %v1159_v39, %v882_v37  ;;  %v471_v44 = vpack.c.bf16 %v1914_v36, %v1913_v35 }
  0xe6   : > { %753 = vrot.lane.b32.xlu0 %v2559_v4, %s2217_s4 }
  0xe7   : > { %v932_v45 = vpop.permute.xlu1 %931 }
  0xe8   : > { %v930_v49 = vpop.permute.xlu0 %929  ;;  %v1227_v17 = vsel %vm1215_vm7, %v1194_v3, %v932_v45  ;;  %v2009_v3 = vld [vmem:[%s2300_s28 + $0x19a] sm:$0xff] }
  0xe9   : > { %803 = vrot.lane.b32.xlu1 %v421_v38, %s2218_s5  ;;  %v1225_v59 = vsel %vm1215_vm7, %v1192_v56, %v930_v49  ;;  %v1946_v49 = vld [vmem:[%s2300_s28 + $0x1a0] sm:$0xff] }
  0xea   : > { %801 = vrot.lane.b32.xlu0 %v564_v15, %s2218_s5  ;;  %v520_v56 = vpack.c.bf16 %v1946_v49, %v1945_v47 }
  0xeb   : > { %v646_v58 = vpop.permute.xlu1 %645 }
  0xec   : > { %v978_v60 = vpop.permute.xlu0 %977  ;;  %v1022_v34 = vsel %vm1001_vm1, %v2400_v57, %v646_v58 }
  0xed   : > { %v1258_v61 = vsel %vm1248_vm8, %v1225_v59, %v978_v60  ;;  %851 = vrot.lane.b32.xlu1 %v469_v51, %s2219_s6  ;;  %v1978_v59 = vld [vmem:[%s2300_s28 + $0x1a1] sm:$0xff] }
  0xee   : > { %849 = vrot.lane.b32.xlu0 %v612_v25, %s2219_s6  ;;  %2068 = vmatprep.mubr.msk.bf16.mxu0 %vm1301_vm9, %v1258_v61  ;;  %v568_v1 = vpack.c.bf16 %v1978_v59, %v1977_v16 }
  0xef   : > { %v648_v26 = vpop.permute.xlu1 %647 }
  0xf0   : > { %v980_v5 = vpop.permute.xlu0 %979  ;;  %v1025_v45 = vsel %vm1001_vm1, %v2416_v2, %v648_v26  ;;  %v2010_v26 = vld [vmem:[%s2300_s28 + $0x1a2] sm:$0xff] }
  0xf1   : > { %v1260_v6 = vsel %vm1248_vm8, %v1227_v17, %v980_v5  ;;  %899 = vrot.lane.b32.xlu1 %v2615_v62, %s2220_s11 }
  0xf2   : > { %897 = vrot.lane.b32.xlu0 %v2585_v33, %s2220_s11  ;;  %2069 = vmatmul.mubr.msk.bf16.gmra.mrb[8].mxu0 %vm1301_vm9, %v1260_v6  ;;  %v616_v6 = vpack.c.bf16 %v2010_v26, %v2009_v3 }
  0xf3   : > { %v696_v8 = vpop.permute.xlu1 %695 }
  0xf4   : > { %v694_v9 = vpop.permute.xlu0 %693  ;;  %v1066_v50 = vsel %vm1050_vm2, %v1025_v45, %v696_v8 }
  0xf5   : > { %947 = vrot.lane.b32.xlu1 %v566_v7, %s2221_s20  ;;  %v1064_v37 = vsel %vm1050_vm2, %v1022_v34, %v694_v9 }
  0xf6   : > { %945 = vrot.lane.b32.xlu0 %v421_v38, %s2221_s20 }
  0xf7   : > { %v744_v10 = vpop.permute.xlu1 %743 }
  0xf8   : > { %v742_v15 = vpop.permute.xlu0 %741  ;;  %v1099_v39 = vsel %vm1083_vm3, %v1066_v50, %v744_v10 }
  0xf9   : > { %661 = vrot.lane.b32.xlu1 %v421_v38, %s2216_s30  ;;  %v1097_v41 = vsel %vm1083_vm3, %v1064_v37, %v742_v15 }
  0xfa   : > { %993 = vrot.lane.b32.xlu0 %v469_v51, %s2222_s25 }
  0xfb   : > { %v792_v19 = vpop.permute.xlu1 %791 }
  0xfc   : > { %v790_v20 = vpop.permute.xlu0 %789  ;;  %v1132_v2 = vsel %vm1116_vm4, %v1099_v39, %v792_v19 }
  0xfd   : > { %663 = vrot.lane.b32.xlu1 %v566_v7, %s2216_s30  ;;  %v1130_v43 = vsel %vm1116_vm4, %v1097_v41, %v790_v20  ;;  %s1815_s30 = sshll.u32 %s169_s24, 1 }
  0xfe   : > { %995 = vrot.lane.b32.xlu0 %v614_v18, %s2222_s25 }
  0xff   : > { %v840_v24 = vpop.permute.xlu1 %839 }
 0x100   : > { %v838_v25 = vpop.permute.xlu0 %837  ;;  %v1165_v58 = vsel %vm1149_vm5, %v1132_v2, %v840_v24 }
 0x101   : > { %711 = vrot.lane.b32.xlu1 %v614_v18, %s2215_s29  ;;  %v1163_v57 = vsel %vm1149_vm5, %v1130_v43, %v838_v25 }
 0x102   : > { %709 = vrot.lane.b32.xlu0 %v469_v51, %s2215_s29  ;;  %s2749_s29 = scalar_lea.vmem %s2948_s2, %s2034_s26 }
 0x103   : > { %v888_v30 = vpop.permute.xlu1 %887 }
 0x104   : > { %v886_v31 = vpop.permute.xlu0 %885  ;;  %v1198_v60 = vsel %vm1182_vm6, %v1165_v58, %v888_v30 }
 0x105   : > { %759 = vrot.lane.b32.xlu1 %v375_v27, %s2217_s4  ;;  %v1196_v51 = vsel %vm1182_vm6, %v1163_v57, %v886_v31 }
 0x106   : > { %757 = vrot.lane.b32.xlu0 %v2615_v62, %s2217_s4  ;;  %s2031_s4 = sshll.u32 %s2265_s16, 5 }
 0x107   : > { %v936_v38 = vpop.permute.xlu1 %935  ;;  %s2904_s9 = scalar_lea.hbm %s2949_s3, %s2031_s4 }
 0x108   : > { %v934_v42 = vpop.permute.xlu0 %933  ;;  %v1231_v61 = vsel %vm1215_vm7, %v1198_v60, %v936_v38 }
 0x109   : > { %807 = vrot.lane.b32.xlu1 %v423_v32, %s2218_s5  ;;  %v1229_v53 = vsel %vm1215_vm7, %v1196_v51, %v934_v42 }
 0x10a   : > { %805 = vrot.lane.b32.xlu0 %v566_v7, %s2218_s5  ;;  %s171_s5 = scalar_lea.vmem [#allocation2], %s1815_s30 }
 0x10b   : > { %v650_v52 = vpop.permute.xlu1 %649 }
 0x10c   : > { %v982_v54 = vpop.permute.xlu0 %981  ;;  %v1028_v19 = vsel %vm1001_vm1, %v2436_v11, %v650_v52 }
 0x10d   : > { %v1262_v55 = vsel %vm1248_vm8, %v1229_v53, %v982_v54  ;;  %855 = vrot.lane.b32.xlu1 %v471_v44, %s2219_s6 }
 0x10e   : > { %853 = vrot.lane.b32.xlu0 %v614_v18, %s2219_s6  ;;  %2072 = vmatprep.mubr.msk.bf16.mxu0 %vm1301_vm9, %v1262_v55  ;;  %s1727_s6 = sshll.u32 %s171_s5, 4  ;;  %s2906_s6 = int_to_ptr.vmem [resolvable:$true] %s1727_s6 }
 0x10f   : > { %v652_v48 = vpop.permute.xlu1 %651  ;;  %s2151_s16 = scalar_lea.vmem %s2906_s6, 32 }
 0x110   : > { %v984_v63 = vpop.permute.xlu0 %983  ;;  %p2152_p11 = scmp.ne.s32.totalorder %s2906_s6, %s2151_s16 }
 0x111   : > { %v1264_v0 = vsel %vm1248_vm8, %v1231_v61, %v984_v63  ;;  %903 = vrot.lane.b32.xlu1 %v520_v56, %s2220_s11 }
 0x112   : > { %901 = vrot.lane.b32.xlu0 %v375_v27, %s2220_s11  ;;  %2073 = vmatmul.mubr.msk.bf16.gmra.mrb[12].mxu0 %vm1301_vm9, %v1264_v0  ;;  %v1031_v27 = vsel %vm1001_vm1, %v2452_v22, %v652_v48  ;;  %p2153_p12 = pnand %p2152_p11, %p2282_p5  ;;  %s2223_s11 = smov [#allocation2]  }
 0x113   : > { %v700_v17 = vpop.permute.xlu1 %699  ;;  %s2155_s17 = sshll.u32 %s2223_s11, 4  ;;  %s2156_s17 = int_to_ptr.vmem [resolvable:$false] %s2155_s17 }
 0x114   : > { %v698_v5 = vpop.permute.xlu0 %697  ;;  %v1070_v29 = vsel %vm1050_vm2, %v1031_v27, %v700_v17  ;;  %p2154_p13 = pneg %p2153_p12  ;;  %s2157_s19 = scalar_lea.vmem %s2156_s17, 64 }
 0x115   : > { %951 = vrot.lane.b32.xlu1 %v568_v1, %s2221_s20  ;;  %v1068_v20 = vsel %vm1050_vm2, %v1028_v19, %v698_v5  ;;  %p2158_p0 = scmp.lt.s32.totalorder %s2906_s6, %s2156_s17  ;;  %p2159_p1 = scmp.lt.s32.totalorder %s2157_s19, %s2151_s16 }
 0x116   : > { %949 = vrot.lane.b32.xlu0 %v423_v32, %s2221_s20 }
 0x117   : > { %v748_v7 = vpop.permute.xlu1 %747  ;;  %p2160_p2 = por %p2159_p1, %p2158_p0 }
 0x118   : > { %v746_v8 = vpop.permute.xlu0 %745  ;;  %v1103_v11 = vsel %vm1083_vm3, %v1070_v29, %v748_v7 }
 0x119   : > { %999 = vrot.lane.b32.xlu1 %v616_v6, %s2222_s25  ;;  %v1101_v23 = vsel %vm1083_vm3, %v1068_v20, %v746_v8  ;;  %p2161_p3 = pnand %p2160_p2, %p2154_p13 }
 0x11a   : > { %997 = vrot.lane.b32.xlu0 %v471_v44, %s2222_s25 }
 0x11b   : > { %v796_v9 = vpop.permute.xlu1 %795 }
 0x11c   : > { %v794_v10 = vpop.permute.xlu0 %793  ;;  %v1136_v35 = vsel %vm1116_vm4, %v1103_v11, %v796_v9 }
 0x11d   : > { %v1134_v25 = vsel %vm1116_vm4, %v1101_v23, %v794_v10 }
 0x11f   : > { %v844_v13 = vpop.permute.xlu1 %843 }
 0x120   : > { %v842_v14 = vpop.permute.xlu0 %841  ;;  %v1169_v37 = vsel %vm1149_vm5, %v1136_v35, %v844_v13 }
 0x121   : > { %v1167_v28 = vsel %vm1149_vm5, %v1134_v25, %v842_v14 }
 0x123   : > { %v892_v15 = vpop.permute.xlu1 %891 }
 0x124   : > { %v890_v18 = vpop.permute.xlu0 %889  ;;  %v1202_v22 = vsel %vm1182_vm6, %v1169_v37, %v892_v15 }
 0x125   : > { %v1200_v30 = vsel %vm1182_vm6, %v1167_v28, %v890_v18 }
 0x127   : > { %v940_v21 = vpop.permute.xlu1 %939 }
 0x128   : > { %v938_v24 = vpop.permute.xlu0 %937  ;;  %v1235_v41 = vsel %vm1215_vm7, %v1202_v22, %v940_v21 }
 0x129   : > { %v1233_v32 = vsel %vm1215_vm7, %v1200_v30, %v938_v24 }
 0x12b   : > { %v654_v31 = vpop.permute.xlu1 %653 }
 0x12c   : > { %v986_v34 = vpop.permute.xlu0 %985  ;;  %v1034_v54 = vsel %vm1001_vm1, %v2474_v46, %v654_v31 }
 0x12d   : > { %v1266_v36 = vsel %vm1248_vm8, %v1233_v32, %v986_v34 }
 0x12e   : > { %2076 = vmatprep.mubr.msk.bf16.mxu1 %vm1301_vm9, %v1266_v36 }
 0x12f   : > { %v656_v38 = vpop.permute.xlu1 %655 }
 0x130   : > { %v988_v42 = vpop.permute.xlu0 %987  ;;  %v1037_v59 = vsel %vm1001_vm1, %v2503_v12, %v656_v38 }
 0x131   : > { %v1268_v43 = vsel %vm1248_vm8, %v1235_v41, %v988_v42 }
 0x132   : > { %2077 = vmatmul.mubr.msk.bf16.vlgmr.msra.gmra.mrb[0].mxu1 %vm1301_vm9, %v1268_v43 }
 0x133   : > { %v704_v44 = vpop.permute.xlu1 %703 }
 0x134   : > { %v702_v45 = vpop.permute.xlu0 %701  ;;  %v1074_v48 = vsel %vm1050_vm2, %v1037_v59, %v704_v44 }
 0x135   : > { %v1072_v2 = vsel %vm1050_vm2, %v1034_v54, %v702_v45 }
 0x137   : > { %v752_v57 = vpop.permute.xlu1 %751 }
 0x138   : > { %v750_v47 = vpop.permute.xlu0 %749  ;;  %v1107_v46 = vsel %vm1083_vm3, %v1074_v48, %v752_v57 }
 0x139   : > { %v1105_v56 = vsel %vm1083_vm3, %v1072_v2, %v750_v47 }
 0x13b   : > { %v800_v49 = vpop.permute.xlu1 %799 }
 0x13c   : > { %v798_v50 = vpop.permute.xlu0 %797  ;;  %v1140_v3 = vsel %vm1116_vm4, %v1107_v46, %v800_v49 }
 0x13d   : > { %v1138_v16 = vsel %vm1116_vm4, %v1105_v56, %v798_v50 }
 0x13f   : > { %v848_v51 = vpop.permute.xlu1 %847 }
 0x140   : > { %v846_v52 = vpop.permute.xlu0 %845  ;;  %v1173_v17 = vsel %vm1149_vm5, %v1140_v3, %v848_v51 }
 0x141   : > { %v1171_v60 = vsel %vm1149_vm5, %v1138_v16, %v846_v52 }
 0x143   : > { %v896_v39 = vpop.permute.xlu1 %895 }
 0x144   : > { %v894_v53 = vpop.permute.xlu0 %893  ;;  %v1206_v12 = vsel %vm1182_vm6, %v1173_v17, %v896_v39 }
 0x145   : > { %v1204_v61 = vsel %vm1182_vm6, %v1171_v60, %v894_v53 }
 0x147   : > { %v944_v55 = vpop.permute.xlu1 %943 }
 0x148   : > { %v942_v58 = vpop.permute.xlu0 %941  ;;  %v1239_v6 = vsel %vm1215_vm7, %v1206_v12, %v944_v55 }
 0x149   : > { %v1237_v0 = vsel %vm1215_vm7, %v1204_v61, %v942_v58 }
 0x14b   : > { %v658_v63 = vpop.permute.xlu1 %657 }
 0x14c   : > { %v990_v1 = vpop.permute.xlu0 %989  ;;  %v1040_v24 = vsel %vm1001_vm1, %v2529_v40, %v658_v63 }
 0x14d   : > { %v1270_v26 = vsel %vm1248_vm8, %v1237_v0, %v990_v1 }
 0x14e   : > { %2080 = vmatprep.mubr.msk.bf16.mxu1 %vm1301_vm9, %v1270_v26 }
 0x14f   : > { %v660_v5 = vpop.permute.xlu1 %659 }
 0x150   : > { %v992_v7 = vpop.permute.xlu0 %991  ;;  %v1043_v31 = vsel %vm1001_vm1, %v2559_v4, %v660_v5 }
 0x151   : > { %v1272_v8 = vsel %vm1248_vm8, %v1239_v6, %v992_v7 }
 0x152   : > { %2081 = vmatmul.mubr.msk.bf16.gmra.mrb[4].mxu1 %vm1301_vm9, %v1272_v8 }
 0x153   : > { %v708_v9 = vpop.permute.xlu1 %707 }
 0x154   : > { %v706_v10 = vpop.permute.xlu0 %705  ;;  %v1078_v32 = vsel %vm1050_vm2, %v1043_v31, %v708_v9 }
 0x155   : > { %v1076_v25 = vsel %vm1050_vm2, %v1040_v24, %v706_v10 }
 0x157   : > { %v756_v13 = vpop.permute.xlu1 %755 }
 0x158   : > { %v754_v14 = vpop.permute.xlu0 %753  ;;  %v1111_v40 = vsel %vm1083_vm3, %v1078_v32, %v756_v13 }
 0x159   : > { %v1109_v28 = vsel %vm1083_vm3, %v1076_v25, %v754_v14 }
 0x15b   : > { %v804_v15 = vpop.permute.xlu1 %803 }
 0x15c   : > { %v802_v18 = vpop.permute.xlu0 %801  ;;  %v1144_v22 = vsel %vm1116_vm4, %v1111_v40, %v804_v15 }
 0x15d   : > { %v1142_v30 = vsel %vm1116_vm4, %v1109_v28, %v802_v18 }
 0x15f   : > { %v852_v19 = vpop.permute.xlu1 %851 }
 0x160   : > { %v850_v20 = vpop.permute.xlu0 %849  ;;  %v1177_v41 = vsel %vm1149_vm5, %v1144_v22, %v852_v19 }
 0x161   : > { %v1175_v11 = vsel %vm1149_vm5, %v1142_v30, %v850_v20 }
 0x163   : > { %v900_v21 = vpop.permute.xlu1 %899 }
 0x164   : > { %v898_v23 = vpop.permute.xlu0 %897  ;;  %v1210_v4 = vsel %vm1182_vm6, %v1177_v41, %v900_v21 }
 0x165   : > { %v1208_v34 = vsel %vm1182_vm6, %v1175_v11, %v898_v23 }
 0x167   : > { %v948_v27 = vpop.permute.xlu1 %947 }
 0x168   : > { %v946_v29 = vpop.permute.xlu0 %945  ;;  %v1243_v43 = vsel %vm1215_vm7, %v1210_v4, %v948_v27 }
 0x169   : > { %v1241_v36 = vsel %vm1215_vm7, %v1208_v34, %v946_v29 }
 0x16b   : > { %v662_v35 = vpop.permute.xlu1 %661 }
 0x16c   : > { %v994_v37 = vpop.permute.xlu0 %993  ;;  %v1046_v2 = vsel %vm1001_vm1, %v2585_v33, %v662_v35 }
 0x16d   : > { %v1274_v38 = vsel %vm1248_vm8, %v1241_v36, %v994_v37 }
 0x16e   : > { %2084 = vmatprep.mubr.msk.bf16.mxu1 %vm1301_vm9, %v1274_v38 }
 0x16f   : > { %v664_v42 = vpop.permute.xlu1 %663 }
 0x170   : > { %v996_v44 = vpop.permute.xlu0 %995  ;;  %v1049_v55 = vsel %vm1001_vm1, %v2615_v62, %v664_v42 }
 0x171   : > { %v1276_v45 = vsel %vm1248_vm8, %v1243_v43, %v996_v44 }
 0x172   : > { %2085 = vmatmul.mubr.msk.bf16.gmra.mrb[8].mxu1 %vm1301_vm9, %v1276_v45 }
 0x173   : > { %v712_v57 = vpop.permute.xlu1 %711 }
 0x174   : > { %v710_v47 = vpop.permute.xlu0 %709  ;;  %v1082_v58 = vsel %vm1050_vm2, %v1049_v55, %v712_v57 }
 0x175   : > { %v1080_v16 = vsel %vm1050_vm2, %v1046_v2, %v710_v47 }
 0x177   : > { %v760_v49 = vpop.permute.xlu1 %759 }
 0x178   : > { %v758_v50 = vpop.permute.xlu0 %757  ;;  %v1115_v60 = vsel %vm1083_vm3, %v1082_v58, %v760_v49 }
 0x179   : > { %v1113_v48 = vsel %vm1083_vm3, %v1080_v16, %v758_v50 }
 0x17b   : > { %v808_v51 = vpop.permute.xlu1 %807 }
 0x17c   : > { %v806_v52 = vpop.permute.xlu0 %805  ;;  %v1148_v33 = vsel %vm1116_vm4, %v1115_v60, %v808_v51 }
 0x17d   : > { %v1146_v63 = vsel %vm1116_vm4, %v1113_v48, %v806_v52 }
 0x17f   : > { %v856_v39 = vpop.permute.xlu1 %855 }
 0x180   : > { %v854_v53 = vpop.permute.xlu0 %853  ;;  %v1181_v1 = vsel %vm1149_vm5, %v1148_v33, %v856_v39 }
 0x181   : > { %v1179_v3 = vsel %vm1149_vm5, %v1146_v63, %v854_v53 }
 0x183   : > { %v904_v54 = vpop.permute.xlu1 %903 }
 0x184   : > { %v902_v56 = vpop.permute.xlu0 %901  ;;  %v1214_v8 = vsel %vm1182_vm6, %v1181_v1, %v904_v54 }
 0x185   : > { %v2062_v59 = vpop.f32.mrb[0].mxu0  ;;  %v1212_v9 = vsel %vm1182_vm6, %v1179_v3, %v902_v56 }
 0x186   : > { %1501 = vst.msk [vmem:[%s2749_s29 + $0x10] sm:$0xff] %vm1001_vm1, %v2062_v59  ;;  %v1372_v61 = vpop.f32.mrb[1].mxu0  ;;  %v1602_v12 = vmul.f32 %v2062_v59, %v2062_v59  ;;  %v1534_v10 = vsel %vm1001_vm1, %v2062_v59, 0.0 }
 0x187   : > { %1499 = vst.msk [vmem:[%s2749_s29] sm:$0xff] %vm1001_vm1, %v1372_v61  ;;  %v1600_v62 = vmul.f32 %v1372_v61, %v1372_v61  ;;  %v2063_v46 = vpop.f32.mrb[2].mxu0  ;;  %v952_v0 = vpop.permute.xlu1 %951  ;;  %v1531_v5 = vsel %vm1001_vm1, %v1372_v61, 0.0 }
 0x188   : > { %1502 = vst.msk [vmem:[%s2749_s29 + $0x18] sm:$0xff] %vm1001_vm1, %v2063_v46  ;;  %v950_v26 = vpop.permute.xlu0 %949  ;;  %v1375_v17 = vpop.f32.mrb[3].mxu0  ;;  %v1603_v15 = vmul.f32 %v2063_v46, %v2063_v46  ;;  %v1247_v18 = vsel %vm1215_vm7, %v1214_v8, %v952_v0  ;;  %v1635_v28 = vsel %vm1001_vm1, %v1602_v12, 0.0  ;;  %v1536_v29 = vsel %vm1001_vm1, %v2063_v46, 0.0 }
 0x189   : > { %1500 = vst.msk [vmem:[%s2749_s29 + $0x8] sm:$0xff] %vm1001_vm1, %v1375_v17  ;;  %v1532_v6 = vsel %vm1001_vm1, %v1375_v17, 0.0  ;;  %v1601_v7 = vmul.f32 %v1375_v17, %v1375_v17  ;;  %v1632_v14 = vsel %vm1001_vm1, %v1600_v62, 0.0  ;;  %v1245_v21 = vsel %vm1215_vm7, %v1212_v9, %v950_v26 }
 0x18a   : > { %v1533_v13 = vadd.f32 %v1532_v6, %v1531_v5  ;;  %v1637_v32 = vsel %vm1001_vm1, %v1603_v15, 0.0 }
 0x18b   : > { %v1633_v19 = vsel %vm1001_vm1, %v1601_v7, 0.0  ;;  %v1000_v20 = vpop.permute.xlu1 %999 }
 0x18c   : > { %v1535_v23 = vadd.f32 %v1534_v10, %v1533_v13  ;;  %v1634_v24 = vadd.f32 %v1633_v19, %v1632_v14  ;;  %v1280_v25 = vsel %vm1248_vm8, %v1247_v18, %v1000_v20  ;;  %v998_v27 = vpop.permute.xlu0 %997 }
 0x18d   : > { %v1278_v30 = vsel %vm1248_vm8, %v1245_v21, %v998_v27 }
 0x18e   : > { %v1636_v31 = vadd.f32 %v1635_v28, %v1634_v24  ;;  %2088 = vmatprep.mubr.msk.bf16.mxu1 %vm1301_vm9, %v1278_v30  ;;  %v1537_v11 = vadd.f32 %v1536_v29, %v1535_v23 }
 0x18f   : > { %2089 = vmatmul.mubr.msk.bf16.gmra.mrb[12].mxu1 %vm1301_vm9, %v1280_v25 }
 0x190   : > { %v1638_v34 = vadd.f32 %v1637_v32, %v1636_v31 }
 0x1a5   : > { %v2066_v35 = vpop.f32.mrb[4].mxu0 }
 0x1a6   : > { %1505 = vst.msk [vmem:[%s2749_s29 + $0x30] sm:$0xff] %vm1001_vm1, %v2066_v35  ;;  %v1388_v40 = vpop.f32.mrb[5].mxu0  ;;  %v1606_v4 = vmul.f32 %v2066_v35, %v2066_v35  ;;  %v1542_v47 = vsel %vm1001_vm1, %v2066_v35, 0.0 }
 0x1a7   : > { %1503 = vst.msk [vmem:[%s2749_s29 + $0x20] sm:$0xff] %vm1001_vm1, %v1388_v40  ;;  %v1538_v36 = vsel %vm1001_vm1, %v1388_v40, 0.0  ;;  %v1604_v37 = vmul.f32 %v1388_v40, %v1388_v40  ;;  %v2067_v22 = vpop.f32.mrb[6].mxu0 }
 0x1a8   : > { %v1539_v38 = vadd.f32 %v1538_v36, %v1537_v11  ;;  %1506 = vst.msk [vmem:[%s2749_s29 + $0x38] sm:$0xff] %vm1001_vm1, %v2067_v22  ;;  %v1391_v41 = vpop.f32.mrb[7].mxu0  ;;  %v1607_v49 = vmul.f32 %v2067_v22, %v2067_v22  ;;  %v1643_v39 = vsel %vm1001_vm1, %v1606_v4, 0.0  ;;  %v1544_v53 = vsel %vm1001_vm1, %v2067_v22, 0.0 }
 0x1a9   : > { %v1639_v42 = vsel %vm1001_vm1, %v1604_v37, 0.0  ;;  %1504 = vst.msk [vmem:[%s2749_s29 + $0x28] sm:$0xff] %vm1001_vm1, %v1391_v41  ;;  %v1540_v43 = vsel %vm1001_vm1, %v1391_v41, 0.0  ;;  %v1605_v44 = vmul.f32 %v1391_v41, %v1391_v41 }
 0x1aa   : > { %v1640_v45 = vadd.f32 %v1639_v42, %v1638_v34  ;;  %v1541_v57 = vadd.f32 %v1540_v43, %v1539_v38  ;;  %v1645_v55 = vsel %vm1001_vm1, %v1607_v49, 0.0 }
 0x1ab   : > { %v1641_v50 = vsel %vm1001_vm1, %v1605_v44, 0.0 }
 0x1ac   : > { %v1543_v51 = vadd.f32 %v1542_v47, %v1541_v57  ;;  %v1642_v52 = vadd.f32 %v1641_v50, %v1640_v45 }
 0x1ae   : > { %v1644_v54 = vadd.f32 %v1643_v39, %v1642_v52  ;;  %v1545_v2 = vadd.f32 %v1544_v53, %v1543_v51 }
 0x1b0   : > { %v1646_v56 = vadd.f32 %v1645_v55, %v1644_v54 }
 0x1c5   : > { %v2070_v58 = vpop.f32.mrb[8].mxu0 }
 0x1c6   : > { %1509 = vst.msk [vmem:[%s2749_s29 + $0x50] sm:$0xff] %vm1001_vm1, %v2070_v58  ;;  %v1404_v16 = vpop.f32.mrb[9].mxu0  ;;  %v1610_v63 = vmul.f32 %v2070_v58, %v2070_v58  ;;  %v1550_v26 = vsel %vm1001_vm1, %v2070_v58, 0.0 }
 0x1c7   : > { %1507 = vst.msk [vmem:[%s2749_s29 + $0x40] sm:$0xff] %vm1001_vm1, %v1404_v16  ;;  %v1546_v59 = vsel %vm1001_vm1, %v1404_v16, 0.0  ;;  %v1608_v60 = vmul.f32 %v1404_v16, %v1404_v16  ;;  %v2071_v48 = vpop.f32.mrb[10].mxu0 }
 0x1c8   : > { %v1547_v61 = vadd.f32 %v1546_v59, %v1545_v2  ;;  %1510 = vst.msk [vmem:[%s2749_s29 + $0x58] sm:$0xff] %vm1001_vm1, %v2071_v48  ;;  %v1407_v33 = vpop.f32.mrb[11].mxu0  ;;  %v1611_v17 = vmul.f32 %v2071_v48, %v2071_v48  ;;  %v1651_v7 = vsel %vm1001_vm1, %v1610_v63, 0.0  ;;  %v1552_v8 = vsel %vm1001_vm1, %v2071_v48, 0.0 }
 0x1c9   : > { %v1647_v62 = vsel %vm1001_vm1, %v1608_v60, 0.0  ;;  %1508 = vst.msk [vmem:[%s2749_s29 + $0x48] sm:$0xff] %vm1001_vm1, %v1407_v33  ;;  %v1548_v46 = vsel %vm1001_vm1, %v1407_v33, 0.0  ;;  %v1609_v0 = vmul.f32 %v1407_v33, %v1407_v33 }
 0x1ca   : > { %v1648_v1 = vadd.f32 %v1647_v62, %v1646_v56  ;;  %v1549_v3 = vadd.f32 %v1548_v46, %v1547_v61  ;;  %v1653_v13 = vsel %vm1001_vm1, %v1611_v17, 0.0 }
 0x1cb   : > { %v1649_v12 = vsel %vm1001_vm1, %v1609_v0, 0.0 }
 0x1cc   : > { %v1551_v5 = vadd.f32 %v1550_v26, %v1549_v3  ;;  %v1650_v6 = vadd.f32 %v1649_v12, %v1648_v1 }
 0x1ce   : > { %v1652_v9 = vadd.f32 %v1651_v7, %v1650_v6  ;;  %v1553_v10 = vadd.f32 %v1552_v8, %v1551_v5 }
 0x1d0   : > { %v1654_v14 = vadd.f32 %v1653_v13, %v1652_v9 }
 0x1e5   : > { %v2074_v15 = vpop.f32.mrb[12].mxu0 }
 0x1e6   : > { %1513 = vst.msk [vmem:[%s2749_s29 + $0x70] sm:$0xff] %vm1001_vm1, %v2074_v15  ;;  %v1420_v18 = vpop.f32.mrb[13].mxu0  ;;  %v1614_v25 = vmul.f32 %v2074_v15, %v2074_v15  ;;  %v1558_v11 = vsel %vm1001_vm1, %v2074_v15, 0.0 }
 0x1e7   : > { %1511 = vst.msk [vmem:[%s2749_s29 + $0x60] sm:$0xff] %vm1001_vm1, %v1420_v18  ;;  %v1554_v19 = vsel %vm1001_vm1, %v1420_v18, 0.0  ;;  %v1612_v20 = vmul.f32 %v1420_v18, %v1420_v18  ;;  %v2075_v21 = vpop.f32.mrb[14].mxu0 }
 0x1e8   : > { %v1555_v23 = vadd.f32 %v1554_v19, %v1553_v10  ;;  %1514 = vst.msk [vmem:[%s2749_s29 + $0x78] sm:$0xff] %vm1001_vm1, %v2075_v21  ;;  %v1423_v24 = vpop.f32.mrb[15].mxu0  ;;  %v1615_v32 = vmul.f32 %v2075_v21, %v2075_v21  ;;  %v1659_v36 = vsel %vm1001_vm1, %v1614_v25, 0.0  ;;  %v1560_v37 = vsel %vm1001_vm1, %v2075_v21, 0.0 }
 0x1e9   : > { %v1655_v27 = vsel %vm1001_vm1, %v1612_v20, 0.0  ;;  %1512 = vst.msk [vmem:[%s2749_s29 + $0x68] sm:$0xff] %vm1001_vm1, %v1423_v24  ;;  %v1556_v28 = vsel %vm1001_vm1, %v1423_v24, 0.0  ;;  %v1613_v29 = vmul.f32 %v1423_v24, %v1423_v24 }
 0x1ea   : > { %v1656_v30 = vadd.f32 %v1655_v27, %v1654_v14  ;;  %v1557_v31 = vadd.f32 %v1556_v28, %v1555_v23  ;;  %v1661_v41 = vsel %vm1001_vm1, %v1615_v32, 0.0 }
 0x1eb   : > { %v1657_v34 = vsel %vm1001_vm1, %v1613_v29, 0.0 }
 0x1ec   : > { %v1559_v35 = vadd.f32 %v1558_v11, %v1557_v31  ;;  %v1658_v40 = vadd.f32 %v1657_v34, %v1656_v30 }
 0x1ee   : > { %v1660_v22 = vadd.f32 %v1659_v36, %v1658_v40  ;;  %v1561_v38 = vadd.f32 %v1560_v37, %v1559_v35 }
 0x1f0   : > { %v1662_v4 = vadd.f32 %v1661_v41, %v1660_v22 }
 0x205   : > { %v2078_v42 = vpop.f32.mrb[0].mxu1 }
 0x206   : > { %1517 = vst.msk [vmem:[%s2749_s29 + $0x90] sm:$0xff] %vm1001_vm1, %v2078_v42  ;;  %v1436_v43 = vpop.f32.mrb[1].mxu1  ;;  %v1618_v50 = vmul.f32 %v2078_v42, %v2078_v42  ;;  %v1566_v2 = vsel %vm1001_vm1, %v2078_v42, 0.0 }
 0x207   : > { %1515 = vst.msk [vmem:[%s2749_s29 + $0x80] sm:$0xff] %vm1001_vm1, %v1436_v43  ;;  %v1562_v44 = vsel %vm1001_vm1, %v1436_v43, 0.0  ;;  %v1616_v45 = vmul.f32 %v1436_v43, %v1436_v43  ;;  %v2079_v57 = vpop.f32.mrb[2].mxu1 }
 0x208   : > { %v1563_v47 = vadd.f32 %v1562_v44, %v1561_v38  ;;  %1518 = vst.msk [vmem:[%s2749_s29 + $0x98] sm:$0xff] %vm1001_vm1, %v2079_v57  ;;  %v1439_v49 = vpop.f32.mrb[3].mxu1  ;;  %v1619_v55 = vmul.f32 %v2079_v57, %v2079_v57  ;;  %v1667_v59 = vsel %vm1001_vm1, %v1618_v50, 0.0  ;;  %v1568_v60 = vsel %vm1001_vm1, %v2079_v57, 0.0 }
 0x209   : > { %v1663_v51 = vsel %vm1001_vm1, %v1616_v45, 0.0  ;;  %1516 = vst.msk [vmem:[%s2749_s29 + $0x88] sm:$0xff] %vm1001_vm1, %v1439_v49  ;;  %v1564_v52 = vsel %vm1001_vm1, %v1439_v49, 0.0  ;;  %v1617_v39 = vmul.f32 %v1439_v49, %v1439_v49 }
 0x20a   : > { %v1664_v53 = vadd.f32 %v1663_v51, %v1662_v4  ;;  %v1565_v54 = vadd.f32 %v1564_v52, %v1563_v47  ;;  %v1669_v33 = vsel %vm1001_vm1, %v1619_v55, 0.0 }
 0x20b   : > { %v1665_v56 = vsel %vm1001_vm1, %v1617_v39, 0.0 }
 0x20c   : > { %v1567_v58 = vadd.f32 %v1566_v2, %v1565_v54  ;;  %v1666_v16 = vadd.f32 %v1665_v56, %v1664_v53 }
 0x20e   : > { %v1668_v48 = vadd.f32 %v1667_v59, %v1666_v16  ;;  %v1569_v61 = vadd.f32 %v1568_v60, %v1567_v58 }
 0x210   : > { %v1670_v63 = vadd.f32 %v1669_v33, %v1668_v48 }
 0x225   : > { %v2082_v62 = vpop.f32.mrb[4].mxu1 }
 0x226   : > { %1521 = vst.msk [vmem:[%s2749_s29 + $0xb0] sm:$0xff] %vm1001_vm1, %v2082_v62  ;;  %v1452_v46 = vpop.f32.mrb[5].mxu1  ;;  %v1622_v12 = vmul.f32 %v2082_v62, %v2082_v62  ;;  %v1574_v10 = vsel %vm1001_vm1, %v2082_v62, 0.0 }
 0x227   : > { %1519 = vst.msk [vmem:[%s2749_s29 + $0xa0] sm:$0xff] %vm1001_vm1, %v1452_v46  ;;  %v1570_v0 = vsel %vm1001_vm1, %v1452_v46, 0.0  ;;  %v1620_v1 = vmul.f32 %v1452_v46, %v1452_v46  ;;  %v2083_v3 = vpop.f32.mrb[6].mxu1 }
 0x228   : > { %v1571_v26 = vadd.f32 %v1570_v0, %v1569_v61  ;;  %1522 = vst.msk [vmem:[%s2749_s29 + $0xb8] sm:$0xff] %vm1001_vm1, %v2083_v3  ;;  %v1455_v17 = vpop.f32.mrb[7].mxu1  ;;  %v1623_v13 = vmul.f32 %v2083_v3, %v2083_v3  ;;  %v1675_v19 = vsel %vm1001_vm1, %v1622_v12, 0.0  ;;  %v1576_v20 = vsel %vm1001_vm1, %v2083_v3, 0.0 }
 0x229   : > { %v1671_v5 = vsel %vm1001_vm1, %v1620_v1, 0.0  ;;  %1520 = vst.msk [vmem:[%s2749_s29 + $0xa8] sm:$0xff] %vm1001_vm1, %v1455_v17  ;;  %v1572_v6 = vsel %vm1001_vm1, %v1455_v17, 0.0  ;;  %v1621_v7 = vmul.f32 %v1455_v17, %v1455_v17 }
 0x22a   : > { %v1672_v8 = vadd.f32 %v1671_v5, %v1670_v63  ;;  %v1573_v9 = vadd.f32 %v1572_v6, %v1571_v26  ;;  %v1677_v24 = vsel %vm1001_vm1, %v1623_v13, 0.0 }
 0x22b   : > { %v1673_v14 = vsel %vm1001_vm1, %v1621_v7, 0.0 }
 0x22c   : > { %v1575_v15 = vadd.f32 %v1574_v10, %v1573_v9  ;;  %v1674_v18 = vadd.f32 %v1673_v14, %v1672_v8 }
 0x22e   : > { %v1676_v21 = vadd.f32 %v1675_v19, %v1674_v18  ;;  %v1577_v23 = vadd.f32 %v1576_v20, %v1575_v15 }
 0x230   : > { %v1678_v25 = vadd.f32 %v1677_v24, %v1676_v21 }
 0x245   : > { %v2086_v27 = vpop.f32.mrb[8].mxu1 }
 0x246   : > { %1525 = vst.msk [vmem:[%s2749_s29 + $0xd0] sm:$0xff] %vm1001_vm1, %v2086_v27  ;;  %v1468_v28 = vpop.f32.mrb[9].mxu1  ;;  %v1626_v34 = vmul.f32 %v2086_v27, %v2086_v27  ;;  %v1582_v38 = vsel %vm1001_vm1, %v2086_v27, 0.0 }
 0x247   : > { %1523 = vst.msk [vmem:[%s2749_s29 + $0xc0] sm:$0xff] %vm1001_vm1, %v1468_v28  ;;  %v1578_v29 = vsel %vm1001_vm1, %v1468_v28, 0.0  ;;  %v1624_v30 = vmul.f32 %v1468_v28, %v1468_v28  ;;  %v2087_v31 = vpop.f32.mrb[10].mxu1 }
 0x248   : > { %v1579_v11 = vadd.f32 %v1578_v29, %v1577_v23  ;;  %1526 = vst.msk [vmem:[%s2749_s29 + $0xd8] sm:$0xff] %vm1001_vm1, %v2087_v31  ;;  %v1471_v32 = vpop.f32.mrb[11].mxu1  ;;  %v1627_v41 = vmul.f32 %v2087_v31, %v2087_v31  ;;  %v1683_v44 = vsel %vm1001_vm1, %v1626_v34, 0.0  ;;  %v1584_v45 = vsel %vm1001_vm1, %v2087_v31, 0.0 }
 0x249   : > { %v1679_v35 = vsel %vm1001_vm1, %v1624_v30, 0.0  ;;  %1524 = vst.msk [vmem:[%s2749_s29 + $0xc8] sm:$0xff] %vm1001_vm1, %v1471_v32  ;;  %v1580_v40 = vsel %vm1001_vm1, %v1471_v32, 0.0  ;;  %v1625_v36 = vmul.f32 %v1471_v32, %v1471_v32 }
 0x24a   : > { %v1680_v37 = vadd.f32 %v1679_v35, %v1678_v25  ;;  %v1581_v22 = vadd.f32 %v1580_v40, %v1579_v11  ;;  %v1685_v49 = vsel %vm1001_vm1, %v1627_v41, 0.0 }
 0x24b   : > { %v1681_v4 = vsel %vm1001_vm1, %v1625_v36, 0.0 }
 0x24c   : > { %v1583_v42 = vadd.f32 %v1582_v38, %v1581_v22  ;;  %v1682_v43 = vadd.f32 %v1681_v4, %v1680_v37 }
 0x24e   : > { %v1684_v57 = vadd.f32 %v1683_v44, %v1682_v43  ;;  %v1585_v47 = vadd.f32 %v1584_v45, %v1583_v42 }
 0x250   : > { %v1686_v50 = vadd.f32 %v1685_v49, %v1684_v57 }
 0x262   : > { %v2090_v51 = vpop.f32.mrb[12].mxu1 }
 0x263   : > { %1529 = vst.msk [vmem:[%s2749_s29 + $0xf0] sm:$0xff] %vm1001_vm1, %v2090_v51  ;;  %v1484_v52 = vpop.f32.mrb[13].mxu1  ;;  %v1630_v56 = vmul.f32 %v2090_v51, %v2090_v51  ;;  %v1590_v61 = vsel %vm1001_vm1, %v2090_v51, 0.0 }
 0x264   : > { %1527 = vst.msk [vmem:[%s2749_s29 + $0xe0] sm:$0xff] %vm1001_vm1, %v1484_v52  ;;  %v1586_v39 = vsel %vm1001_vm1, %v1484_v52, 0.0  ;;  %v1628_v53 = vmul.f32 %v1484_v52, %v1484_v52  ;;  %v2091_v54 = vpop.f32.mrb[14].mxu1 }
 0x265   : > { %v1587_v2 = vadd.f32 %v1586_v39, %v1585_v47  ;;  %1530 = vst.msk [vmem:[%s2749_s29 + $0xf8] sm:$0xff] %vm1001_vm1, %v2091_v54  ;;  %v1487_v55 = vpop.f32.mrb[15].mxu1  ;;  %v1631_v33 = vmul.f32 %v2091_v54, %v2091_v54  ;;  %v1691_v0 = vsel %vm1001_vm1, %v1630_v56, 0.0  ;;  %v1592_v1 = vsel %vm1001_vm1, %v2091_v54, 0.0 }
 0x266   : > { %v1687_v58 = vsel %vm1001_vm1, %v1628_v53, 0.0  ;;  %1528 = vst.msk [vmem:[%s2749_s29 + $0xe8] sm:$0xff] %vm1001_vm1, %v1487_v55  ;;  %v1588_v16 = vsel %vm1001_vm1, %v1487_v55, 0.0  ;;  %v1629_v59 = vmul.f32 %v1487_v55, %v1487_v55 }
 0x267   : > { %v1688_v60 = vadd.f32 %v1687_v58, %v1686_v50  ;;  %v1589_v48 = vadd.f32 %v1588_v16, %v1587_v2  ;;  %v1693_v17 = vsel %vm1001_vm1, %v1631_v33, 0.0 }
 0x268   : > { %v1689_v63 = vsel %vm1001_vm1, %v1629_v59, 0.0 }
 0x269   : > { %v1591_v62 = vadd.f32 %v1590_v61, %v1589_v48  ;;  %v1690_v46 = vadd.f32 %v1689_v63, %v1688_v60 }
 0x26b   : > { %v1593_v3 = vadd.f32 %v1592_v1, %v1591_v62  ;;  %v1692_v26 = vadd.f32 %v1691_v0, %v1690_v46 }
 0x26d   : > { %v1594_v12 = vrot.slane %v1593_v3, 4  ;;  %v1694_v5 = vadd.f32 %v1693_v17, %v1692_v26 }
 0x26f   : > { %v1595_v6 = vadd.f32 %v1594_v12, %v1593_v3  ;;  %v1695_v7 = vrot.slane %v1694_v5, 4 }
 0x271   : > { %v1596_v8 = vrot.slane %v1595_v6, 2  ;;  %v1696_v9 = vadd.f32 %v1695_v7, %v1694_v5 }
 0x273   : > { %v1597_v10 = vadd.f32 %v1596_v8, %v1595_v6  ;;  %v1697_v13 = vrot.slane %v1696_v9, 2 }
 0x275   : > { %v1598_v14 = vrot.slane %v1597_v10, 1  ;;  %v1698_v15 = vadd.f32 %v1697_v13, %v1696_v9 }
 0x277   : > { %v1699_v18 = vrot.slane %v1698_v15, 1  ;;  %v1599_v19 = vadd.f32 %v1598_v14, %v1597_v10 }
 0x279   : > { %v1700_v20 = vadd.f32 %v1699_v18, %v1698_v15 }
 0x27b   : > { %v1702_v21 = vsel %vm1701_vm10, %v1599_v19, %v1700_v20 }
 0x27c   : > { %1704 = vst.msk [vmem:[%s171_s5] sm:$0x3] %vm1703_vm11, %v1702_v21 }
 0x27d   : > { %2164 = shalt.err (!%p2161_p3)
}
 0x27e   : > { %s2165_s20 = scalar_lea.hbm %s2904_s9, 32  ;;  %s2169_s27 = scalar_lea.hbm %s2949_s3, 64 }
 0x27f   : > { %p2166_p4 = scmp.ne.s32.totalorder %s2904_s9, %s2165_s20  ;;  %p2170_p9 = scmp.lt.u32.totalorder %s2904_s9, %s2949_s3 }
 0x280   : > { %p2171_p10 = scmp.lt.u32.totalorder %s2169_s27, %s2165_s20  ;;  %p2173_p12 = scmp.lt.u32.totalorder %s2165_s20, %s2904_s9 }
 0x281   : > { %p2167_p7 = pnand %p2166_p4, %p2282_p5 }
 0x282   : > { %p2172_p11 = por %p2171_p10, %p2170_p9 }
 0x283   : > { %p2168_p8 = pneg %p2167_p7 }
 0x284   : > { %p2174_p13 = por %p2173_p12, %p2172_p11 }
 0x286   : > { %p2175_p0 = pnand %p2174_p13, %p2168_p8 }
 0x288   : > { %2178 = shalt.err (!%p2175_p0)
}
 0x289   : > { %2101 = dma.vmem_to_hbm [thread:$0]  (%p2282_p5), %s2906_s6, 32, %s2904_s9, %s1711_s10  }
 0x28a PF: > { %p2107_p1 = scmp.ge.s32.totalorder %s2213_s15, 2  ;;  %s1747_s24 = sand.u32 1, %s2201_s12  }
 0x28b   : > { %s1748_s30 = scalar_lea.sflag [#allocation3], %s1747_s24 }
 0x28c   : > { %p2104_p2 = pnand %p2107_p1, %p2286_p6 }
 0x28e   : > { %2196 = dma.done.wait (!%p2104_p2), %s1748_s30, 32  }
 0x28f   : > { %2198 = vsyncadd (!%p2104_p2), %s1748_s30, 4294967264  ;;  %p14_p3 = scmp.ge.s32.totalorder %s2269_s18, 4   ;;  %s2952_s12 = smov %s2205_s13 }
 0x290   : > { %s2953_s13 = smov %s2209_s14  ;;  %s2954_s14 = smov %s2280_s21 }
 0x291   : > { %s2955_s15 = smov %s2269_s18  ;;  %16 = sbr.rel (!%p14_p3) target bundleno = 3 (0x3), region = 77 }
 0x298   :  { %1753 = vsyncpa [#allocation3], 1 }
 0x299   :  { %1755 = vsyncpa [#allocation3 + $0x1], 1 }

</bundles_post_ra>
